<compile_context>
chip_gen: v6e
topology: v6e:2x2x1
jax: 0.10.0
libtpu: 0.0.40
codegen_flags: <defaults>
</compile_context>

<pallas_src>
import functools

import numpy as np

import jax
import jax.numpy as jnp
from jax import lax
from jax.experimental import pallas as pl
from jax.experimental.pallas import tpu as pltpu


def _round_up(x, m):
    return ((x + m - 1) // m) * m


def _pick_tile(n, requested, gran):
    """Tile size for a 'parallel' grid axis: a multiple of `gran`, at most
    `requested`, and small enough that the (padded) axis splits into >= 2
    tiles whenever the problem allows it (keeps both v7x TensorCores busy)."""
    n_r = _round_up(max(n, 1), gran)
    half = _round_up(max((n + 1) // 2, 1), gran)
    return max(gran, min(_round_up(requested, gran), half, n_r))


# ----------------------------------------------------------------------------
# Host-side preprocessing of the static KG edge list.
# ----------------------------------------------------------------------------
def prepare_edges(edge_head, edge_tail, edge_type, n_entities, *,
                  tm=512, te=2048):
    """Sort edges by head so every entity tile reads a contiguous edge range
    (single pass over the edge stream), and precompute:
      * per-entity-tile edge-block offsets/counts (scalar-prefetched, drive
        the data-dependent index_maps),
      * per-entity inverse in-degree (hop-invariant scatter-mean count).

    tm is kept moderate on purpose: with the sorted-edge layout every edge is
    visited ~once, so the masked-matmul work per edge scales with tm; 512
    fills one MXU M-pass while bounding the VPU mask-build cost.
    """
    head = np.asarray(edge_head, dtype=np.int32)
    tail = np.asarray(edge_tail, dtype=np.int32)
    etype = np.asarray(edge_type, dtype=np.int32)
    n_edges = int(head.shape[0])

    tm_eff = _pick_tile(n_entities, tm, 16)           # 16: bf16 sublane tile
    ne_pad = _round_up(n_entities, tm_eff)
    n_tiles = ne_pad // tm_eff

    te_eff = min(te, _round_up(n_edges, 128))
    nedge_pad = _round_up(n_edges, te_eff)
    n_blocks = nedge_pad // te_eff
    pad = nedge_pad - n_edges

    order = np.argsort(head, kind="stable")
    # padded edges: head sentinel = ne_pad (> any entity id -> masked out,
    # and keeps the array sorted)
    head_s = np.concatenate([head[order], np.full((pad,), ne_pad, np.int32)])
    tail_s = np.concatenate([tail[order], np.zeros((pad,), np.int32)])
    etype_s = np.concatenate([etype[order], np.zeros((pad,), np.int32)])

    # contiguous edge range of entity tile i -> covering block range
    bounds = np.arange(n_tiles + 1, dtype=np.int64) * tm_eff
    e_bounds = np.searchsorted(head_s, bounds, side="left")
    blk_start = np.minimum(e_bounds[:-1] // te_eff, n_blocks - 1)
    blk_end = -(-e_bounds[1:] // te_eff)                      # ceil div
    nblk = np.where(e_bounds[1:] > e_bounds[:-1], blk_end - blk_start, 0)
    blk_start = blk_start.astype(np.int32)
    nblk = nblk.astype(np.int32)
    max_nblk = max(int(nblk.max()) if n_tiles > 0 else 1, 1)

    # hop-invariant in-degree -> the scatter-mean count never touches the MXU
    deg = np.bincount(head, minlength=ne_pad).astype(np.float32)
    inv_deg = (1.0 / np.maximum(deg, 1.0)).reshape(ne_pad, 1)

    return dict(
        head_lane=jnp.asarray(head_s.reshape(1, nedge_pad)),   # lane-dense
        tail_sorted=jnp.asarray(tail_s),
        etype_sorted=jnp.asarray(etype_s),
        blk_start=jnp.asarray(blk_start),
        nblk=jnp.asarray(nblk),
        inv_deg=jnp.asarray(inv_deg),
        tm=tm_eff, te=te_eff, max_nblk=max_nblk)


# ----------------------------------------------------------------------------
# Kernel 1: KG aggregate.
#   entity_agg = scatter_mean(entity_emb[tail] * relation_emb[edge_type],
#                             index=head, dim_size=n_entities)
#   followed by F.normalize(..., dim=1)
# Scatter(head) as a masked MXU matmul over the (sorted) edge stream:
#   mask[r, c] = (head[c] == ent_tile_base + r);  acc += mask @ msg
# The per-edge message is precomputed in XLA; counts are hop-invariant and
# applied as a precomputed inverse-degree in the epilogue.
# ----------------------------------------------------------------------------
def _kg_agg_kernel(blk_start_ref, nblk_ref, head_ref, msg_ref, invdeg_ref,
                   out_f32_ref, out_bf16_ref, acc_ref):
    i = pl.program_id(0)
    j = pl.program_id(1)

    @pl.when(j == 0)
    def _():
        acc_ref[...] = jnp.zeros_like(acc_ref)

    @pl.when(j < nblk_ref[i])
    def _():
        tm = acc_ref.shape[0]
        te = msg_ref.shape[0]
        # mask[r, c] = (head[c] - i*tm == r): scatter as masked matmul (MXU)
        rel_head = head_ref[...] - i * tm                          # (1, te)
        row_ids = lax.broadcasted_iota(jnp.int32, (tm, te), 0)     # (tm, te)
        mask = (row_ids == rel_head).astype(jnp.bfloat16)
        acc_ref[...] += jnp.dot(mask, msg_ref[...],
                                preferred_element_type=jnp.float32)

    @pl.when(j == pl.num_programs(1) - 1)
    def _():
        # scatter_mean: divide by (host-precomputed) in-degree; empty rows -> 0
        mean = acc_ref[...] * invdeg_ref[...]
        # F.normalize(dim=1): x / max(||x||, 1e-12) == x * rsqrt(max(ss, 1e-24))
        ss = jnp.sum(mean * mean, axis=1, keepdims=True)
        normed = mean * lax.rsqrt(jnp.maximum(ss, 1e-24))
        out_f32_ref[...] = normed
        out_bf16_ref[...] = normed.astype(jnp.bfloat16)


def kg_aggregate(head_lane, msg, blk_start, nblk, inv_deg, n_entities,
                 *, tm, te, max_nblk):
    """head_lane: (1, E_pad) int32 sorted heads; msg: (E_pad, D) bf16 messages.

    Returns (f32, bf16) aggregated + L2-normalized entity embeddings,
    both (n_entities, D).
    """
    nedge_pad = head_lane.shape[1]
    d = msg.shape[1]
    ne_pad = inv_deg.shape[0]
    n_tiles = ne_pad // tm
    assert nedge_pad % te == 0 and ne_pad % tm == 0

    def _blk(i, j, bs, nb):
        # clamp so steps past this tile's range repeat the same block
        # (no extra DMA); their compute is skipped via pl.when above.
        return bs[i] + jnp.minimum(j, jnp.maximum(nb[i] - 1, 0))

    head_map = lambda i, j, bs, nb: (0, _blk(i, j, bs, nb))
    msg_map = lambda i, j, bs, nb: (_blk(i, j, bs, nb), 0)
    ent_map = lambda i, j, bs, nb: (i, 0)

    out_f32, out_bf16 = pl.pallas_call(
        _kg_agg_kernel,
        out_shape=(jax.ShapeDtypeStruct((ne_pad, d), jnp.float32),
                   jax.ShapeDtypeStruct((ne_pad, d), jnp.bfloat16)),
        grid_spec=pltpu.PrefetchScalarGridSpec(
            num_scalar_prefetch=2,
            grid=(n_tiles, max_nblk),
            in_specs=[
                pl.BlockSpec((1, te), head_map),        # sorted head ids
                pl.BlockSpec((te, d), msg_map),         # per-edge messages
                pl.BlockSpec((tm, 1), ent_map),         # inverse in-degree
            ],
            out_specs=[pl.BlockSpec((tm, d), ent_map),
                       pl.BlockSpec((tm, d), ent_map)],
            scratch_shapes=[pltpu.VMEM((tm, d), jnp.float32)]),
        compiler_params=pltpu.CompilerParams(
            dimension_semantics=("parallel", "arbitrary"),
            vmem_limit_bytes=32 * 1024 * 1024),
    )(blk_start, nblk, head_lane, msg, inv_deg)
    return out_f32[:n_entities], out_bf16[:n_entities]


# ----------------------------------------------------------------------------
# Kernel 2: user aggregate (tiled K-reduction over entities).
#   score    = softmax(user_emb @ latent_emb.T, dim=1)
#   user_agg = interact_mat @ entity_emb          (accumulated over k tiles)
#   user_agg = (score @ disen_weight) * user_agg + user_agg
#   out      = F.normalize(user_agg, dim=1)
# interact_mat streams from HBM as int8 (0/1 exact) and is upcast to bf16
# in-kernel; the kernel is HBM-bound on that stream, so halving it is the win.
# ----------------------------------------------------------------------------
def _user_agg_kernel(u_ref, lat_ref, imat_ref, ent_ref, dw_ref, out_ref,
                     acc_ref):
    k = pl.program_id(1)

    @pl.when(k == 0)
    def _():
        acc_ref[...] = jnp.zeros_like(acc_ref)

    # int8 -> bf16 upcast on the VPU (hidden under the imat DMA), bf16 MXU
    # matmul with f32 accumulation.
    acc_ref[...] += jnp.dot(imat_ref[...].astype(jnp.bfloat16), ent_ref[...],
                            preferred_element_type=jnp.float32)

    @pl.when(k == pl.num_programs(1) - 1)
    def _():
        u = u_ref[...]
        # score = softmax(user_emb @ latent_emb.T, dim=1)
        s = lax.dot_general(u, lat_ref[...], (((1,), (1,)), ((), ())),
                            preferred_element_type=jnp.float32)
        s = s - jnp.max(s, axis=1, keepdims=True)
        e = jnp.exp(s)
        score = e / jnp.sum(e, axis=1, keepdims=True)

        mod = jnp.dot(score, dw_ref[...], preferred_element_type=jnp.float32)
        ua = acc_ref[...]
        ua = mod * ua + ua

        ss = jnp.sum(ua * ua, axis=1, keepdims=True)
        out_ref[...] = (ua * lax.rsqrt(jnp.maximum(ss, 1e-24))
                        ).astype(out_ref.dtype)


def user_aggregate(user_emb, latent_emb, imat_i8, entity_emb_bf16, disen_w,
                   *, tmu=1024, tk=4096):
    """Returns the aggregated + L2-normalized user embeddings (n_users, D)."""
    nu, d = user_emb.shape
    nf = latent_emb.shape[0]
    ne = entity_emb_bf16.shape[0]

    # int8 rows -> 32-sublane granularity on the user axis; >=2 tiles when
    # possible (v7x megacore).  Block budget at defaults: imat int8 4 MiB x2,
    # in-kernel bf16 copy 8 MiB, ent bf16 ~1 MiB x2, acc/user/out < 2 MiB
    # -> ~20 MiB, well under the 40 MiB limit below (and v7x's 64 MiB VMEM).
    tmu_eff = _pick_tile(nu, tmu, 32)
    tk_eff = min(tk, _round_up(ne, 128))
    nu_pad = _round_up(nu, tmu_eff)
    ne_pad = _round_up(ne, tk_eff)

    u_p = jnp.pad(user_emb, ((0, nu_pad - nu), (0, 0)))
    imat_p = jnp.pad(imat_i8, ((0, nu_pad - nu), (0, ne_pad - ne)))
    ent_p = jnp.pad(entity_emb_bf16, ((0, ne_pad - ne), (0, 0)))

    out = pl.pallas_call(
        _user_agg_kernel,
        out_shape=jax.ShapeDtypeStruct((nu_pad, d), jnp.float32),
        grid_spec=pltpu.PrefetchScalarGridSpec(
            num_scalar_prefetch=0,
            grid=(nu_pad // tmu_eff, ne_pad // tk_eff),
            in_specs=[
                pl.BlockSpec((tmu_eff, d), lambda i, k: (i, 0)),       # users
                pl.BlockSpec((nf, d), lambda i, k: (0, 0)),            # latent
                pl.BlockSpec((tmu_eff, tk_eff), lambda i, k: (i, k)),  # imat i8
                pl.BlockSpec((tk_eff, d), lambda i, k: (k, 0)),        # ents
                pl.BlockSpec((nf, d), lambda i, k: (0, 0)),            # disen_w
            ],
            out_specs=pl.BlockSpec((tmu_eff, d), lambda i, k: (i, 0)),
            scratch_shapes=[pltpu.VMEM((tmu_eff, d), jnp.float32)]),
        compiler_params=pltpu.CompilerParams(
            dimension_semantics=("parallel", "arbitrary"),
            vmem_limit_bytes=40 * 1024 * 1024),
    )(u_p, latent_emb, imat_p, ent_p, disen_w)
    return out[:nu]


# ----------------------------------------------------------------------------
# GraphConv forward (JAX orchestration over the Pallas kernels).
# ----------------------------------------------------------------------------
def mutual_information_loss(disen_weight_att, temperature):
    # calculate_cor_loss with ind='mi' (tiny: n_factors x n_relations).
    norm = jnp.sqrt(jnp.sum(disen_weight_att ** 2, axis=1, keepdims=True))
    nt = disen_weight_att / jnp.maximum(norm, 1e-12)
    scores = jnp.exp(nt @ nt.T / temperature)
    return -jnp.sum(jnp.log(jnp.diag(scores) / jnp.sum(scores, axis=1)))


@functools.partial(jax.jit,
                   static_argnames=("n_hops", "tm", "te", "max_nblk"))
def graph_conv_forward(user_emb, entity_emb, latent_emb, relation_emb,
                       disen_weight_att, interact_mat,
                       head_lane, tail_sorted, etype_sorted,
                       blk_start, nblk, inv_deg,
                       *, n_hops, temperature, tm, te, max_nblk):
    n_entities = entity_emb.shape[0]
    entity_res_emb = entity_emb
    user_res_emb = user_emb

    # hop-invariant factor embedding (4x8 @ 8xD) -> plain JAX (a standalone
    # pallas_call here would be pure launch overhead).
    disen_w = jax.nn.softmax(disen_weight_att, axis=-1) @ relation_emb

    # interaction matrix values are 0/1 -> int8 is exact and halves/quarters
    # the dominant HBM stream of kernel 2 (upcast to bf16 in-kernel).
    imat_i8 = interact_mat.astype(jnp.int8)

    # first hop's bf16 entity operand; later hops reuse kernel 1's bf16 output
    ent_bf16 = entity_emb.astype(jnp.bfloat16)

    # relation gather is hop-invariant -> hoisted out of the hop loop
    rel_g = jnp.take(relation_emb, etype_sorted, axis=0)

    for _ in range(n_hops):
        # --- KG aggregate ---
        # per-edge message (tail gather * relation) stays in XLA: one
        # streaming pass; cast to bf16 replaces the tail stream the kernel
        # would otherwise read.
        msg = (jnp.take(entity_emb, tail_sorted, axis=0) * rel_g
               ).astype(jnp.bfloat16)
        entity_new, entity_new_bf16 = kg_aggregate(
            head_lane, msg, blk_start, nblk, inv_deg, n_entities,
            tm=tm, te=te, max_nblk=max_nblk)

        # --- user aggregate --- (uses this hop's *input* entity table)
        user_new = user_aggregate(user_emb, latent_emb, imat_i8, ent_bf16,
                                  disen_w)

        # mess_dropout skipped (eval mode); normalize fused into the kernels.
        entity_emb, ent_bf16, user_emb = entity_new, entity_new_bf16, user_new
        entity_res_emb = entity_res_emb + entity_emb
        user_res_emb = user_res_emb + user_emb

    cor_loss = mutual_information_loss(disen_weight_att, temperature)
    return entity_res_emb, user_res_emb, cor_loss


# ----------------------------------------------------------------------------
# Pure-JAX reference (mirrors the PyTorch module in eval mode).
# ----------------------------------------------------------------------------
def _reference_forward(user_emb, entity_emb, latent_emb, relation_emb,
                       disen_weight_att, edge_head, edge_tail, edge_type,
                       interact_mat, n_hops, temperature):
    def normalize(x):
        return x / jnp.maximum(jnp.linalg.norm(x, axis=1, keepdims=True),
                               1e-12)

    n_entities = entity_emb.shape[0]
    entity_res, user_res = entity_emb, user_emb
    disen_w = jax.nn.softmax(disen_weight_att, axis=-1) @ relation_emb
    for _ in range(n_hops):
        neigh = entity_emb[edge_tail] * relation_emb[edge_type]
        s = jnp.zeros((n_entities, neigh.shape[1]),
                      neigh.dtype).at[edge_head].add(neigh)
        c = jnp.zeros((n_entities,), neigh.dtype).at[edge_head].add(1.0)
        entity_agg = s / jnp.maximum(c, 1.0)[:, None]

        score = jax.nn.softmax(user_emb @ latent_emb.T, axis=1)
        user_agg = interact_mat @ entity_emb
        user_agg = (score @ disen_w) * user_agg + user_agg

        entity_emb = normalize(entity_agg)
        user_emb = normalize(user_agg)
        entity_res = entity_res + entity_emb
        user_res = user_res + user_emb
    cor = mutual_information_loss(disen_weight_att, temperature)
    return entity_res, user_res, cor


# ----------------------------------------------------------------------------
# Driver
# ----------------------------------------------------------------------------
if __name__ == "__main__":
    key = jax.random.PRNGKey(0)
    (k_user, k_ent, k_lat, k_rel, k_att, k_head, k_tail, k_etype,
     k_imat) = jax.random.split(key, 9)

    # small, shape-consistent problem
    embedding_size = 32
    n_users = 16
    n_entities = 64
    n_relations = 8
    n_factors = 4
    n_edges = 256
    n_hops = 2
    temperature = 0.2

    def xavier(k, shape):
        fan_in, fan_out = shape[1], shape[0]
        bound = (6.0 / (fan_in + fan_out)) ** 0.5
        return jax.random.uniform(k, shape, jnp.float32, -bound, bound)

    user_emb = xavier(k_user, (n_users, embedding_size))
    entity_emb = xavier(k_ent, (n_entities, embedding_size))
    latent_emb = xavier(k_lat, (n_factors, embedding_size))
    relation_emb = xavier(k_rel, (n_relations, embedding_size))   # nn.Embedding
    disen_weight_att = xavier(k_att, (n_factors, n_relations))    # nn.Parameter

    edge_head = jax.random.randint(k_head, (n_edges,), 0, n_entities, jnp.int32)
    edge_tail = jax.random.randint(k_tail, (n_edges,), 0, n_entities, jnp.int32)
    edge_type = jax.random.randint(k_etype, (n_edges,), 0, n_relations, jnp.int32)

    # dense stand-in for the sparse user-item interaction matrix (binary)
    interact_mat = (jax.random.uniform(k_imat, (n_users, n_entities)) < 0.1
                    ).astype(jnp.float32)

    # host-side, one-off preprocessing of the static graph
    plan = prepare_edges(edge_head, edge_tail, edge_type, n_entities)

    ent_out, usr_out, cor = graph_conv_forward(
        user_emb, entity_emb, latent_emb, relation_emb, disen_weight_att,
        interact_mat,
        plan["head_lane"], plan["tail_sorted"], plan["etype_sorted"],
        plan["blk_start"], plan["nblk"], plan["inv_deg"],
        n_hops=n_hops, temperature=temperature,
        tm=plan["tm"], te=plan["te"], max_nblk=plan["max_nblk"])
    jax.block_until_ready((ent_out, usr_out, cor))

    assert ent_out.shape == (n_entities, embedding_size)
    assert usr_out.shape == (n_users, embedding_size)
    assert bool(jnp.all(jnp.isfinite(ent_out)))
    assert bool(jnp.all(jnp.isfinite(usr_out)))
    assert bool(jnp.isfinite(cor))

    # correctness vs. pure-JAX reference (bf16/int8 streams -> loose tolerance)
    ent_ref, usr_ref, cor_ref = _reference_forward(
        user_emb, entity_emb, latent_emb, relation_emb, disen_weight_att,
        edge_head, edge_tail, edge_type, interact_mat, n_hops, temperature)
    np.testing.assert_allclose(np.asarray(ent_out), np.asarray(ent_ref),
                               rtol=5e-2, atol=5e-2)
    np.testing.assert_allclose(np.asarray(usr_out), np.asarray(usr_ref),
                               rtol=5e-2, atol=5e-2)
    np.testing.assert_allclose(float(cor), float(cor_ref), rtol=1e-3, atol=1e-3)

    print("KERNEL_OK")
</pallas_src>

<mosaic_0001>
module attributes {stable_mosaic.version = 11 : i64} {
  func.func @_user_agg_kernel(%arg0: i32, %arg1: i32, %arg2: memref<32x32xf32, #tpu.memory_space<vmem>>, %arg3: memref<4x32xf32, #tpu.memory_space<vmem>>, %arg4: memref<32x128xi8, #tpu.memory_space<vmem>>, %arg5: memref<128x32xbf16, #tpu.memory_space<vmem>>, %arg6: memref<4x32xf32, #tpu.memory_space<vmem>>, %arg7: memref<32x32xf32, #tpu.memory_space<vmem>>, %arg8: memref<32x32xf32, #tpu.memory_space<vmem>>) attributes {dimension_semantics = [#tpu.dimension_semantics<parallel>, #tpu.dimension_semantics<arbitrary>], iteration_bounds = array<i64: 1, 1>, scalar_prefetch = 0 : i64, scratch_operands = 1 : i64, tpu.core_type = #tpu.core_type<tc>, window_params = [{transform_indices = @transform_0, window_bounds = array<i64: 32, 32>}, {pipeline_mode = #tpu.pipeline_mode<synchronous>, transform_indices = @transform_1, window_bounds = array<i64: 4, 32>}, {transform_indices = @transform_2, window_bounds = array<i64: 32, 128>}, {transform_indices = @transform_3, window_bounds = array<i64: 128, 32>}, {pipeline_mode = #tpu.pipeline_mode<synchronous>, transform_indices = @transform_4, window_bounds = array<i64: 4, 32>}, {transform_indices = @transform_5, window_bounds = array<i64: 32, 32>}]} {
    %c0_i32 = arith.constant 0 : i32
    %0 = arith.cmpi eq, %arg1, %c0_i32 : i32
    %1 = arith.extui %0 : i1 to i32
    %c0_i32_0 = arith.constant 0 : i32
    %2 = arith.cmpi ne, %1, %c0_i32_0 : i32
    scf.if %2 {
      %cst_10 = arith.constant 0.000000e+00 : f32
      %13 = vector.broadcast %cst_10 : f32 to vector<32x32xf32>
      %c0_11 = arith.constant 0 : index
      %c0_12 = arith.constant 0 : index
      %14 = vector.load %arg8[%c0_11, %c0_12] : memref<32x32xf32, #tpu.memory_space<vmem>>, vector<32x32xf32>
      tpu.vector_store %arg8[%c0_11, %c0_12], %13 {strides = array<i32>} : memref<32x32xf32, #tpu.memory_space<vmem>>, vector<32x32xf32>,
    } else {
    }
    %c0 = arith.constant 0 : index
    %c0_1 = arith.constant 0 : index
    %3 = vector.load %arg8[%c0, %c0_1] : memref<32x32xf32, #tpu.memory_space<vmem>>, vector<32x32xf32>
    %c0_2 = arith.constant 0 : index
    %c0_3 = arith.constant 0 : index
    %4 = vector.load %arg4[%c0_2, %c0_3] : memref<32x128xi8, #tpu.memory_space<vmem>>, vector<32x128xi8>
    %5 = arith.sitofp %4 : vector<32x128xi8> to vector<32x128xbf16>
    %c0_4 = arith.constant 0 : index
    %c0_5 = arith.constant 0 : index
    %6 = vector.load %arg5[%c0_4, %c0_5] : memref<128x32xbf16, #tpu.memory_space<vmem>>, vector<128x32xbf16>
    %cst = arith.constant dense<0.000000e+00> : vector<32x32xf32>
    %7 = tpu.matmul %5, %6, %cst {dimension_numbers = #tpu.dot_dimension_numbers<[1], [0], [0], [1], [0, 0, 1, 1], [], []>} : vector<32x128xbf16>, vector<128x32xbf16>, vector<32x32xf32> -> vector<32x32xf32>
    %8 = arith.addf %3, %7 : vector<32x32xf32>
    %c0_6 = arith.constant 0 : index
    %c0_7 = arith.constant 0 : index
    %9 = vector.load %arg8[%c0_6, %c0_7] : memref<32x32xf32, #tpu.memory_space<vmem>>, vector<32x32xf32>
    tpu.vector_store %arg8[%c0_6, %c0_7], %8 {strides = array<i32>} : memref<32x32xf32, #tpu.memory_space<vmem>>, vector<32x32xf32>,
    %c0_i32_8 = arith.constant 0 : i32
    %10 = arith.cmpi eq, %arg1, %c0_i32_8 : i32
    %11 = arith.extui %10 : i1 to i32
    %c0_i32_9 = arith.constant 0 : i32
    %12 = arith.cmpi ne, %11, %c0_i32_9 : i32
    scf.if %12 {
      %c0_10 = arith.constant 0 : index
      %c0_11 = arith.constant 0 : index
      %13 = vector.load %arg2[%c0_10, %c0_11] : memref<32x32xf32, #tpu.memory_space<vmem>>, vector<32x32xf32>
      %c0_12 = arith.constant 0 : index
      %c0_13 = arith.constant 0 : index
      %14 = vector.load %arg3[%c0_12, %c0_13] : memref<4x32xf32, #tpu.memory_space<vmem>>, vector<4x32xf32>
      %cst_14 = arith.constant dense<0.000000e+00> : vector<32x4xf32>
      %15 = tpu.matmul %13, %14, %cst_14 {dimension_numbers = #tpu.dot_dimension_numbers<[1], [1], [0], [0], [0, 0, 1, 0], [], []>} : vector<32x32xf32>, vector<4x32xf32>, vector<32x4xf32> -> vector<32x4xf32>
      %cst_15 = arith.constant dense<0xFF800000> : vector<32xf32>
      %16 = vector.multi_reduction <maximumf>, %15, %cst_15 [1] : vector<32x4xf32> to vector<32xf32>
      %17 = vector.shape_cast %16 : vector<32xf32> to vector<32x1xf32>
      %18 = vector.broadcast %17 : vector<32x1xf32> to vector<32x4xf32>
      %19 = arith.subf %15, %18 : vector<32x4xf32>
      %20 = math.exp %19 : vector<32x4xf32>
      %cst_16 = arith.constant dense<0.000000e+00> : vector<32xf32>
      %21 = vector.multi_reduction <add>, %20, %cst_16 [1] : vector<32x4xf32> to vector<32xf32>
      %22 = vector.shape_cast %21 : vector<32xf32> to vector<32x1xf32>
      %23 = vector.broadcast %22 : vector<32x1xf32> to vector<32x4xf32>
      %24 = arith.divf %20, %23 : vector<32x4xf32>
      %c0_17 = arith.constant 0 : index
      %c0_18 = arith.constant 0 : index
      %25 = vector.load %arg6[%c0_17, %c0_18] : memref<4x32xf32, #tpu.memory_space<vmem>>, vector<4x32xf32>
      %cst_19 = arith.constant dense<0.000000e+00> : vector<32x32xf32>
      %26 = tpu.matmul %24, %25, %cst_19 {dimension_numbers = #tpu.dot_dimension_numbers<[1], [0], [0], [1], [0, 0, 1, 1], [], []>} : vector<32x4xf32>, vector<4x32xf32>, vector<32x32xf32> -> vector<32x32xf32>
      %c0_20 = arith.constant 0 : index
      %c0_21 = arith.constant 0 : index
      %27 = vector.load %arg8[%c0_20, %c0_21] : memref<32x32xf32, #tpu.memory_space<vmem>>, vector<32x32xf32>
      %28 = arith.mulf %26, %27 : vector<32x32xf32>
      %29 = arith.addf %28, %27 : vector<32x32xf32>
      %30 = arith.mulf %29, %29 : vector<32x32xf32>
      %cst_22 = arith.constant dense<0.000000e+00> : vector<32xf32>
      %31 = vector.multi_reduction <add>, %30, %cst_22 [1] : vector<32x32xf32> to vector<32xf32>
      %32 = vector.shape_cast %31 : vector<32xf32> to vector<32x1xf32>
      %cst_23 = arith.constant 1.000000e-24 : f32
      %33 = vector.broadcast %cst_23 : f32 to vector<32x1xf32>
      %34 = arith.maximumf %32, %33 : vector<32x1xf32>
      %35 = math.rsqrt %34 : vector<32x1xf32>
      %36 = vector.broadcast %35 : vector<32x1xf32> to vector<32x32xf32>
      %37 = arith.mulf %29, %36 : vector<32x32xf32>
      %c0_24 = arith.constant 0 : index
      %c0_25 = arith.constant 0 : index
      %38 = vector.load %arg7[%c0_24, %c0_25] : memref<32x32xf32, #tpu.memory_space<vmem>>, vector<32x32xf32>
      tpu.vector_store %arg7[%c0_24, %c0_25], %37 {strides = array<i32>} : memref<32x32xf32, #tpu.memory_space<vmem>>, vector<32x32xf32>,
    } else {
    }
    return
  }
  func.func @transform_0(%arg0: i32, %arg1: i32) -> (i32, i32) {
    %c0_i32 = arith.constant 0 : i32
    %c0_i32_0 = arith.constant 0 : i32
    return %arg0, %c0_i32 : i32, i32
  }
  func.func @transform_1(%arg0: i32, %arg1: i32) -> (i32, i32) {
    %c0_i32 = arith.constant 0 : i32
    %c0_i32_0 = arith.constant 0 : i32
    %c0_i32_1 = arith.constant 0 : i32
    return %c0_i32, %c0_i32_0 : i32, i32
  }
  func.func @transform_2(%arg0: i32, %arg1: i32) -> (i32, i32) {
    %c0_i32 = arith.constant 0 : i32
    return %arg0, %arg1 : i32, i32
  }
  func.func @transform_3(%arg0: i32, %arg1: i32) -> (i32, i32) {
    %c0_i32 = arith.constant 0 : i32
    %c0_i32_0 = arith.constant 0 : i32
    return %arg1, %c0_i32 : i32, i32
  }
  func.func @transform_4(%arg0: i32, %arg1: i32) -> (i32, i32) {
    %c0_i32 = arith.constant 0 : i32
    %c0_i32_0 = arith.constant 0 : i32
    %c0_i32_1 = arith.constant 0 : i32
    return %c0_i32, %c0_i32_0 : i32, i32
  }
  func.func @transform_5(%arg0: i32, %arg1: i32) -> (i32, i32) {
    %c0_i32 = arith.constant 0 : i32
    %c0_i32_0 = arith.constant 0 : i32
    return %arg0, %c0_i32 : i32, i32
  }
}

module attributes {stable_mosaic.version = 11 : i64} {
  func.func @_kg_agg_kernel(%arg0: i32, %arg1: i32, %arg2: memref<2xi32, #tpu.memory_space<smem>>, %arg3: memref<2xi32, #tpu.memory_space<smem>>, %arg4: memref<1x256xi32, #tpu.memory_space<vmem>>, %arg5: memref<256x32xbf16, #tpu.memory_space<vmem>>, %arg6: memref<32x1xf32, #tpu.memory_space<vmem>>, %arg7: memref<32x32xf32, #tpu.memory_space<vmem>>, %arg8: memref<32x32xbf16, #tpu.memory_space<vmem>>, %arg9: memref<32x32xf32, #tpu.memory_space<vmem>>) attributes {dimension_semantics = [#tpu.dimension_semantics<parallel>, #tpu.dimension_semantics<arbitrary>], iteration_bounds = array<i64: 2, 1>, scalar_prefetch = 2 : i64, scratch_operands = 1 : i64, tpu.core_type = #tpu.core_type<tc>, window_params = [{transform_indices = @transform_0, window_bounds = array<i64: 1, 256>}, {transform_indices = @transform_1, window_bounds = array<i64: 256, 32>}, {transform_indices = @transform_2, window_bounds = array<i64: 32, 1>}, {transform_indices = @transform_3, window_bounds = array<i64: 32, 32>}, {transform_indices = @transform_4, window_bounds = array<i64: 32, 32>}]} {
    %c0_i32 = arith.constant 0 : i32
    %0 = arith.cmpi eq, %arg1, %c0_i32 : i32
    %1 = arith.extui %0 : i1 to i32
    %c0_i32_0 = arith.constant 0 : i32
    %2 = arith.cmpi ne, %1, %c0_i32_0 : i32
    scf.if %2 {
      %cst = arith.constant 0.000000e+00 : f32
      %11 = vector.broadcast %cst : f32 to vector<32x32xf32>
      %c0 = arith.constant 0 : index
      %c0_4 = arith.constant 0 : index
      %12 = vector.load %arg9[%c0, %c0_4] : memref<32x32xf32, #tpu.memory_space<vmem>>, vector<32x32xf32>
      tpu.vector_store %arg9[%c0, %c0_4], %11 {strides = array<i32>} : memref<32x32xf32, #tpu.memory_space<vmem>>, vector<32x32xf32>,
    } else {
    }
    %3 = arith.index_cast %arg0 : i32 to index
    %4 = memref.load %arg3[%3] : memref<2xi32, #tpu.memory_space<smem>>
    %5 = arith.cmpi slt, %arg1, %4 : i32
    %6 = arith.extui %5 : i1 to i32
    %c0_i32_1 = arith.constant 0 : i32
    %7 = arith.cmpi ne, %6, %c0_i32_1 : i32
    scf.if %7 {
      %c0 = arith.constant 0 : index
      %c0_4 = arith.constant 0 : index
      %11 = vector.load %arg4[%c0, %c0_4] : memref<1x256xi32, #tpu.memory_space<vmem>>, vector<1x256xi32>
      %c32_i32 = arith.constant 32 : i32
      %12 = arith.muli %arg0, %c32_i32 : i32
      %13 = vector.broadcast %12 : i32 to vector<1x256xi32>
      %14 = arith.subi %11, %13 : vector<1x256xi32>
      %15 = tpu.iota {dimensions = array<i32: 0>} : vector<32x256xi32>
      %16 = vector.broadcast %14 : vector<1x256xi32> to vector<32x256xi32>
      %17 = arith.cmpi eq, %15, %16 : vector<32x256xi32>
      %18 = arith.extui %17 : vector<32x256xi1> to vector<32x256xi32>
      %19 = arith.sitofp %18 : vector<32x256xi32> to vector<32x256xf32>
      %20 = arith.truncf %19 : vector<32x256xf32> to vector<32x256xbf16>
      %c0_5 = arith.constant 0 : index
      %c0_6 = arith.constant 0 : index
      %21 = vector.load %arg9[%c0_5, %c0_6] : memref<32x32xf32, #tpu.memory_space<vmem>>, vector<32x32xf32>
      %c0_7 = arith.constant 0 : index
      %c0_8 = arith.constant 0 : index
      %22 = vector.load %arg5[%c0_7, %c0_8] : memref<256x32xbf16, #tpu.memory_space<vmem>>, vector<256x32xbf16>
      %cst = arith.constant dense<0.000000e+00> : vector<32x32xf32>
      %23 = tpu.matmul %20, %22, %cst {dimension_numbers = #tpu.dot_dimension_numbers<[1], [0], [0], [1], [0, 0, 1, 1], [], []>} : vector<32x256xbf16>, vector<256x32xbf16>, vector<32x32xf32> -> vector<32x32xf32>
      %24 = arith.addf %21, %23 : vector<32x32xf32>
      %c0_9 = arith.constant 0 : index
      %c0_10 = arith.constant 0 : index
      %25 = vector.load %arg9[%c0_9, %c0_10] : memref<32x32xf32, #tpu.memory_space<vmem>>, vector<32x32xf32>
      tpu.vector_store %arg9[%c0_9, %c0_10], %24 {strides = array<i32>} : memref<32x32xf32, #tpu.memory_space<vmem>>, vector<32x32xf32>,
    } else {
    }
    %c0_i32_2 = arith.constant 0 : i32
    %8 = arith.cmpi eq, %arg1, %c0_i32_2 : i32
    %9 = arith.extui %8 : i1 to i32
    %c0_i32_3 = arith.constant 0 : i32
    %10 = arith.cmpi ne, %9, %c0_i32_3 : i32
    scf.if %10 {
      %c0 = arith.constant 0 : index
      %c0_4 = arith.constant 0 : index
      %11 = vector.load %arg9[%c0, %c0_4] : memref<32x32xf32, #tpu.memory_space<vmem>>, vector<32x32xf32>
      %c0_5 = arith.constant 0 : index
      %c0_6 = arith.constant 0 : index
      %12 = vector.load %arg6[%c0_5, %c0_6] : memref<32x1xf32, #tpu.memory_space<vmem>>, vector<32x1xf32>
      %13 = vector.broadcast %12 : vector<32x1xf32> to vector<32x32xf32>
      %14 = arith.mulf %11, %13 : vector<32x32xf32>
      %15 = arith.mulf %14, %14 : vector<32x32xf32>
      %cst = arith.constant dense<0.000000e+00> : vector<32xf32>
      %16 = vector.multi_reduction <add>, %15, %cst [1] : vector<32x32xf32> to vector<32xf32>
      %17 = vector.shape_cast %16 : vector<32xf32> to vector<32x1xf32>
      %cst_7 = arith.constant 1.000000e-24 : f32
      %18 = vector.broadcast %cst_7 : f32 to vector<32x1xf32>
      %19 = arith.maximumf %17, %18 : vector<32x1xf32>
      %20 = math.rsqrt %19 : vector<32x1xf32>
      %21 = vector.broadcast %20 : vector<32x1xf32> to vector<32x32xf32>
      %22 = arith.mulf %14, %21 : vector<32x32xf32>
      %c0_8 = arith.constant 0 : index
      %c0_9 = arith.constant 0 : index
      %23 = vector.load %arg7[%c0_8, %c0_9] : memref<32x32xf32, #tpu.memory_space<vmem>>, vector<32x32xf32>
      tpu.vector_store %arg7[%c0_8, %c0_9], %22 {strides = array<i32>} : memref<32x32xf32, #tpu.memory_space<vmem>>, vector<32x32xf32>,
      %24 = arith.truncf %22 : vector<32x32xf32> to vector<32x32xbf16>
      %c0_10 = arith.constant 0 : index
      %c0_11 = arith.constant 0 : index
      %25 = vector.load %arg8[%c0_10, %c0_11] : memref<32x32xbf16, #tpu.memory_space<vmem>>, vector<32x32xbf16>
      tpu.vector_store %arg8[%c0_10, %c0_11], %24 {strides = array<i32>} : memref<32x32xbf16, #tpu.memory_space<vmem>>, vector<32x32xbf16>,
    } else {
    }
    return
  }
  func.func @transform_0(%arg0: i32, %arg1: i32, %arg2: memref<2xi32, #tpu.memory_space<smem>>, %arg3: memref<2xi32, #tpu.memory_space<smem>>) -> (i32, i32) {
    %0 = arith.index_cast %arg0 : i32 to index
    %1 = memref.load %arg2[%0] : memref<2xi32, #tpu.memory_space<smem>>
    %2 = arith.index_cast %arg0 : i32 to index
    %3 = memref.load %arg3[%2] : memref<2xi32, #tpu.memory_space<smem>>
    %c1_i32 = arith.constant 1 : i32
    %4 = arith.subi %3, %c1_i32 : i32
    %c0_i32 = arith.constant 0 : i32
    %5 = arith.maxsi %4, %c0_i32 : i32
    %6 = arith.minsi %arg1, %5 : i32
    %7 = arith.addi %1, %6 : i32
    %c0_i32_0 = arith.constant 0 : i32
    %c0_i32_1 = arith.constant 0 : i32
    return %c0_i32_0, %7 : i32, i32
  }
  func.func @transform_1(%arg0: i32, %arg1: i32, %arg2: memref<2xi32, #tpu.memory_space<smem>>, %arg3: memref<2xi32, #tpu.memory_space<smem>>) -> (i32, i32) {
    %0 = arith.index_cast %arg0 : i32 to index
    %1 = memref.load %arg2[%0] : memref<2xi32, #tpu.memory_space<smem>>
    %2 = arith.index_cast %arg0 : i32 to index
    %3 = memref.load %arg3[%2] : memref<2xi32, #tpu.memory_space<smem>>
    %c1_i32 = arith.constant 1 : i32
    %4 = arith.subi %3, %c1_i32 : i32
    %c0_i32 = arith.constant 0 : i32
    %5 = arith.maxsi %4, %c0_i32 : i32
    %6 = arith.minsi %arg1, %5 : i32
    %7 = arith.addi %1, %6 : i32
    %c0_i32_0 = arith.constant 0 : i32
    %c0_i32_1 = arith.constant 0 : i32
    return %7, %c0_i32_0 : i32, i32
  }
  func.func @transform_2(%arg0: i32, %arg1: i32, %arg2: memref<2xi32, #tpu.memory_space<smem>>, %arg3: memref<2xi32, #tpu.memory_space<smem>>) -> (i32, i32) {
    %c0_i32 = arith.constant 0 : i32
    %c0_i32_0 = arith.constant 0 : i32
    return %arg0, %c0_i32 : i32, i32
  }
  func.func @transform_3(%arg0: i32, %arg1: i32, %arg2: memref<2xi32, #tpu.memory_space<smem>>, %arg3: memref<2xi32, #tpu.memory_space<smem>>) -> (i32, i32) {
    %c0_i32 = arith.constant 0 : i32
    %c0_i32_0 = arith.constant 0 : i32
    return %arg0, %c0_i32 : i32, i32
  }
  func.func @transform_4(%arg0: i32, %arg1: i32, %arg2: memref<2xi32, #tpu.memory_space<smem>>, %arg3: memref<2xi32, #tpu.memory_space<smem>>) -> (i32, i32) {
    %c0_i32 = arith.constant 0 : i32
    %c0_i32_0 = arith.constant 0 : i32
    return %arg0, %c0_i32 : i32, i32
  }
}

module attributes {stable_mosaic.version = 11 : i64} {
  func.func @_kg_agg_kernel(%arg0: i32, %arg1: i32, %arg2: memref<2xi32, #tpu.memory_space<smem>>, %arg3: memref<2xi32, #tpu.memory_space<smem>>, %arg4: memref<1x256xi32, #tpu.memory_space<vmem>>, %arg5: memref<256x32xbf16, #tpu.memory_space<vmem>>, %arg6: memref<32x1xf32, #tpu.memory_space<vmem>>, %arg7: memref<32x32xf32, #tpu.memory_space<vmem>>, %arg8: memref<32x32xbf16, #tpu.memory_space<vmem>>, %arg9: memref<32x32xf32, #tpu.memory_space<vmem>>) attributes {dimension_semantics = [#tpu.dimension_semantics<parallel>, #tpu.dimension_semantics<arbitrary>], iteration_bounds = array<i64: 2, 1>, scalar_prefetch = 2 : i64, scratch_operands = 1 : i64, tpu.core_type = #tpu.core_type<tc>, window_params = [{transform_indices = @transform_0, window_bounds = array<i64: 1, 256>}, {transform_indices = @transform_1, window_bounds = array<i64: 256, 32>}, {transform_indices = @transform_2, window_bounds = array<i64: 32, 1>}, {transform_indices = @transform_3, window_bounds = array<i64: 32, 32>}, {transform_indices = @transform_4, window_bounds = array<i64: 32, 32>}]} {
    %c0_i32 = arith.constant 0 : i32
    %0 = arith.cmpi eq, %arg1, %c0_i32 : i32
    %1 = arith.extui %0 : i1 to i32
    %c0_i32_0 = arith.constant 0 : i32
    %2 = arith.cmpi ne, %1, %c0_i32_0 : i32
    scf.if %2 {
      %cst = arith.constant 0.000000e+00 : f32
      %11 = vector.broadcast %cst : f32 to vector<32x32xf32>
      %c0 = arith.constant 0 : index
      %c0_4 = arith.constant 0 : index
      %12 = vector.load %arg9[%c0, %c0_4] : memref<32x32xf32, #tpu.memory_space<vmem>>, vector<32x32xf32>
      tpu.vector_store %arg9[%c0, %c0_4], %11 {strides = array<i32>} : memref<32x32xf32, #tpu.memory_space<vmem>>, vector<32x32xf32>,
    } else {
    }
    %3 = arith.index_cast %arg0 : i32 to index
    %4 = memref.load %arg3[%3] : memref<2xi32, #tpu.memory_space<smem>>
    %5 = arith.cmpi slt, %arg1, %4 : i32
    %6 = arith.extui %5 : i1 to i32
    %c0_i32_1 = arith.constant 0 : i32
    %7 = arith.cmpi ne, %6, %c0_i32_1 : i32
    scf.if %7 {
      %c0 = arith.constant 0 : index
      %c0_4 = arith.constant 0 : index
      %11 = vector.load %arg4[%c0, %c0_4] : memref<1x256xi32, #tpu.memory_space<vmem>>, vector<1x256xi32>
      %c32_i32 = arith.constant 32 : i32
      %12 = arith.muli %arg0, %c32_i32 : i32
      %13 = vector.broadcast %12 : i32 to vector<1x256xi32>
      %14 = arith.subi %11, %13 : vector<1x256xi32>
      %15 = tpu.iota {dimensions = array<i32: 0>} : vector<32x256xi32>
      %16 = vector.broadcast %14 : vector<1x256xi32> to vector<32x256xi32>
      %17 = arith.cmpi eq, %15, %16 : vector<32x256xi32>
      %18 = arith.extui %17 : vector<32x256xi1> to vector<32x256xi32>
      %19 = arith.sitofp %18 : vector<32x256xi32> to vector<32x256xf32>
      %20 = arith.truncf %19 : vector<32x256xf32> to vector<32x256xbf16>
      %c0_5 = arith.constant 0 : index
      %c0_6 = arith.constant 0 : index
      %21 = vector.load %arg9[%c0_5, %c0_6] : memref<32x32xf32, #tpu.memory_space<vmem>>, vector<32x32xf32>
      %c0_7 = arith.constant 0 : index
      %c0_8 = arith.constant 0 : index
      %22 = vector.load %arg5[%c0_7, %c0_8] : memref<256x32xbf16, #tpu.memory_space<vmem>>, vector<256x32xbf16>
      %cst = arith.constant dense<0.000000e+00> : vector<32x32xf32>
      %23 = tpu.matmul %20, %22, %cst {dimension_numbers = #tpu.dot_dimension_numbers<[1], [0], [0], [1], [0, 0, 1, 1], [], []>} : vector<32x256xbf16>, vector<256x32xbf16>, vector<32x32xf32> -> vector<32x32xf32>
      %24 = arith.addf %21, %23 : vector<32x32xf32>
      %c0_9 = arith.constant 0 : index
      %c0_10 = arith.constant 0 : index
      %25 = vector.load %arg9[%c0_9, %c0_10] : memref<32x32xf32, #tpu.memory_space<vmem>>, vector<32x32xf32>
      tpu.vector_store %arg9[%c0_9, %c0_10], %24 {strides = array<i32>} : memref<32x32xf32, #tpu.memory_space<vmem>>, vector<32x32xf32>,
    } else {
    }
    %c0_i32_2 = arith.constant 0 : i32
    %8 = arith.cmpi eq, %arg1, %c0_i32_2 : i32
    %9 = arith.extui %8 : i1 to i32
    %c0_i32_3 = arith.constant 0 : i32
    %10 = arith.cmpi ne, %9, %c0_i32_3 : i32
    scf.if %10 {
      %c0 = arith.constant 0 : index
      %c0_4 = arith.constant 0 : index
      %11 = vector.load %arg9[%c0, %c0_4] : memref<32x32xf32, #tpu.memory_space<vmem>>, vector<32x32xf32>
      %c0_5 = arith.constant 0 : index
      %c0_6 = arith.constant 0 : index
      %12 = vector.load %arg6[%c0_5, %c0_6] : memref<32x1xf32, #tpu.memory_space<vmem>>, vector<32x1xf32>
      %13 = vector.broadcast %12 : vector<32x1xf32> to vector<32x32xf32>
      %14 = arith.mulf %11, %13 : vector<32x32xf32>
      %15 = arith.mulf %14, %14 : vector<32x32xf32>
      %cst = arith.constant dense<0.000000e+00> : vector<32xf32>
      %16 = vector.multi_reduction <add>, %15, %cst [1] : vector<32x32xf32> to vector<32xf32>
      %17 = vector.shape_cast %16 : vector<32xf32> to vector<32x1xf32>
      %cst_7 = arith.constant 1.000000e-24 : f32
      %18 = vector.broadcast %cst_7 : f32 to vector<32x1xf32>
      %19 = arith.maximumf %17, %18 : vector<32x1xf32>
      %20 = math.rsqrt %19 : vector<32x1xf32>
      %21 = vector.broadcast %20 : vector<32x1xf32> to vector<32x32xf32>
      %22 = arith.mulf %14, %21 : vector<32x32xf32>
      %c0_8 = arith.constant 0 : index
      %c0_9 = arith.constant 0 : index
      %23 = vector.load %arg7[%c0_8, %c0_9] : memref<32x32xf32, #tpu.memory_space<vmem>>, vector<32x32xf32>
      tpu.vector_store %arg7[%c0_8, %c0_9], %22 {strides = array<i32>} : memref<32x32xf32, #tpu.memory_space<vmem>>, vector<32x32xf32>,
      %24 = arith.truncf %22 : vector<32x32xf32> to vector<32x32xbf16>
      %c0_10 = arith.constant 0 : index
      %c0_11 = arith.constant 0 : index
      %25 = vector.load %arg8[%c0_10, %c0_11] : memref<32x32xbf16, #tpu.memory_space<vmem>>, vector<32x32xbf16>
      tpu.vector_store %arg8[%c0_10, %c0_11], %24 {strides = array<i32>} : memref<32x32xbf16, #tpu.memory_space<vmem>>, vector<32x32xbf16>,
    } else {
    }
    return
  }
  func.func @transform_0(%arg0: i32, %arg1: i32, %arg2: memref<2xi32, #tpu.memory_space<smem>>, %arg3: memref<2xi32, #tpu.memory_space<smem>>) -> (i32, i32) {
    %0 = arith.index_cast %arg0 : i32 to index
    %1 = memref.load %arg2[%0] : memref<2xi32, #tpu.memory_space<smem>>
    %2 = arith.index_cast %arg0 : i32 to index
    %3 = memref.load %arg3[%2] : memref<2xi32, #tpu.memory_space<smem>>
    %c1_i32 = arith.constant 1 : i32
    %4 = arith.subi %3, %c1_i32 : i32
    %c0_i32 = arith.constant 0 : i32
    %5 = arith.maxsi %4, %c0_i32 : i32
    %6 = arith.minsi %arg1, %5 : i32
    %7 = arith.addi %1, %6 : i32
    %c0_i32_0 = arith.constant 0 : i32
    %c0_i32_1 = arith.constant 0 : i32
    return %c0_i32_0, %7 : i32, i32
  }
  func.func @transform_1(%arg0: i32, %arg1: i32, %arg2: memref<2xi32, #tpu.memory_space<smem>>, %arg3: memref<2xi32, #tpu.memory_space<smem>>) -> (i32, i32) {
    %0 = arith.index_cast %arg0 : i32 to index
    %1 = memref.load %arg2[%0] : memref<2xi32, #tpu.memory_space<smem>>
    %2 = arith.index_cast %arg0 : i32 to index
    %3 = memref.load %arg3[%2] : memref<2xi32, #tpu.memory_space<smem>>
    %c1_i32 = arith.constant 1 : i32
    %4 = arith.subi %3, %c1_i32 : i32
    %c0_i32 = arith.constant 0 : i32
    %5 = arith.maxsi %4, %c0_i32 : i32
    %6 = arith.minsi %arg1, %5 : i32
    %7 = arith.addi %1, %6 : i32
    %c0_i32_0 = arith.constant 0 : i32
    %c0_i32_1 = arith.constant 0 : i32
    return %7, %c0_i32_0 : i32, i32
  }
  func.func @transform_2(%arg0: i32, %arg1: i32, %arg2: memref<2xi32, #tpu.memory_space<smem>>, %arg3: memref<2xi32, #tpu.memory_space<smem>>) -> (i32, i32) {
    %c0_i32 = arith.constant 0 : i32
    %c0_i32_0 = arith.constant 0 : i32
    return %arg0, %c0_i32 : i32, i32
  }
  func.func @transform_3(%arg0: i32, %arg1: i32, %arg2: memref<2xi32, #tpu.memory_space<smem>>, %arg3: memref<2xi32, #tpu.memory_space<smem>>) -> (i32, i32) {
    %c0_i32 = arith.constant 0 : i32
    %c0_i32_0 = arith.constant 0 : i32
    return %arg0, %c0_i32 : i32, i32
  }
  func.func @transform_4(%arg0: i32, %arg1: i32, %arg2: memref<2xi32, #tpu.memory_space<smem>>, %arg3: memref<2xi32, #tpu.memory_space<smem>>) -> (i32, i32) {
    %c0_i32 = arith.constant 0 : i32
    %c0_i32_0 = arith.constant 0 : i32
    return %arg0, %c0_i32 : i32, i32
  }
}

</mosaic_0001>

<bundles_post_ra>
// kernel: graph_conv_forward.5
= control target key start
LH: loop header
LB: loop body
LE: loop exit
PB: predicated region body
PF: predicated region fallthrough
CT: control target
= control target key end

     0   :  { %vm25_vm0 = vcmask 261120   ;;  %vm267_vm1 = vcmask 31744   ;;  %vm325_vm2 = vcmask 1043456   ;;  %v569_v45 = vmov 0.0   ;;  %s691_s1 = inlined_call_operand.vmem [shape: f32[4,32], index: 1, kind: input, shape index: {}]   ;;  %s692_s0 = inlined_call_operand.vmem [shape: f32[32,32], index: 0, kind: input, shape index: {}]   ;;  %s693_s3 = inlined_call_operand.vmem [shape: bf16[128,32], index: 3, kind: input, shape index: {}]   ;;  %s694_s2 = inlined_call_operand.vmem [shape: s8[32,128], index: 2, kind: input, shape index: {}]   ;;  %s695_s4 = inlined_call_operand.vmem [shape: f32[4,32], index: 4, kind: input, shape index: {}]   ;;  %s696_s5 = inlined_call_operand.vmem [shape: f32[32,32], index: 5, kind: output, shape index: {}]  }
   0x1   :  { %v166_v0 = vld [vmem:[%s691_s1] sm:$0xf]  ;;  %v163_v2 = vld [vmem:[%s692_s0 + $0x8] sm:$0xff]  ;;  %v164_v3 = vld [vmem:[%s692_s0 + $0x10] sm:$0xff]  ;;  %28 = vst.msk [vmem:[#allocation2 + $0x10] sm:$0xff] %vm25_vm0, %v569_v45 }
   0x2   :  { %v162_v1 = vld [vmem:[%s692_s0] sm:$0xff]  ;;  %520 = vmatprep.subr.msk.mxu1 %vm25_vm0, %v166_v0  ;;  %v165_v4 = vld [vmem:[%s692_s0 + $0x18] sm:$0xff]  ;;  %v538_v14 = vld [vmem:[%s693_s3 + $0x30] sm:$0xff]   ;;  %26 = vst.msk [vmem:[#allocation2] sm:$0xff] %vm25_vm0, %v569_v45 }
   0x3   :  { %522 = vmatprep.mubr.msk.f32.mxu1 %vm25_vm0, %v162_v1  ;;  %521 = vmatpush3.xpose.msk.msra.mxu1 %vm25_vm0, %v166_v0  ;;  %v537_v13 = vld [vmem:[%s693_s3 + $0x38] sm:$0xff]   ;;  %v539_v15 = vld [vmem:[%s693_s3 + $0x28] sm:$0xff]   ;;  %v540_v16 = vld [vmem:[%s693_s3 + $0x20] sm:$0xff]   ;;  %27 = vst.msk [vmem:[#allocation2 + $0x8] sm:$0xff] %vm25_vm0, %v569_v45 }
   0x4   :  { %500 = vmatprep.subr.bf16.mxu0 %v537_v13  ;;  %v34_v17 = vld [vmem:[%s694_s2] sm:$0xff]  ;;  %v541_v19 = vld [vmem:[%s693_s3 + $0x18] sm:$0xff]   ;;  %v542_v20 = vld [vmem:[%s693_s3 + $0x10] sm:$0xff]   ;;  %29 = vst.msk [vmem:[#allocation2 + $0x18] sm:$0xff] %vm25_vm0, %v569_v45 }
   0x5   :  { %501 = vmatpush3.bf16.msra.mxu0 %v537_v13  ;;  %v35_v18 = vunpack.c.l.s8.bf16 %v34_v17  ;;  %v543_v21 = vld [vmem:[%s693_s3 + $0x8] sm:$0xff]   ;;  %v544_v22 = vld [vmem:[%s693_s3] sm:$0xff]   ;;  %v36_v23 = vunpack.c.h.s8.bf16 %v34_v17 }
   0x6   :  { %523 = vmatmul.mubr.msk.f32.vlgmr.msra.gmra.mxu1 %vm25_vm0, %v163_v2  ;;  %502 = vmatprep.subr.bf16.mxu0 %v538_v14  ;;  %v312_v44 = vld [vmem:[%s695_s4] sm:$0xf] }
   0x7   :  { %525 = vmatprep.mubr.msk.f32.mxu1 %vm25_vm0, %v164_v3  ;;  %516 = vmatprep.mubr.bf16.mxu0 %v35_v18 }
   0x8   :  { %528 = vmatprep.subr.msk.mxu1 %vm325_vm2, %v312_v44  ;;  %v32_v46 = vld [vmem:[#allocation2 + $0x10] sm:$0xff] }
   0x9   :  { %503 = vmatpush3.bf16.msra.mxu0 %v538_v14  ;;  %529 = vmatpush3.msk.msra.mxu1 %vm325_vm2, %v312_v44  ;;  %v30_v48 = vld [vmem:[#allocation2] sm:$0xff] }
   0xa   :  { %526 = vmatmul.mubr.msk.f32.gmra.mxu1 %vm25_vm0, %v165_v4  ;;  %504 = vmatprep.subr.bf16.mxu0 %v539_v15  ;;  %v31_v54 = vld [vmem:[#allocation2 + $0x8] sm:$0xff] }
   0xb   :  { %v33_v51 = vld [vmem:[#allocation2 + $0x18] sm:$0xff] }
   0xd   :  { %505 = vmatpush3.bf16.msra.mxu0 %v539_v15 }
   0xe   :  { %506 = vmatprep.subr.bf16.mxu0 %v540_v16 }
  0x11   :  { %507 = vmatpush3.bf16.msra.mxu0 %v540_v16 }
  0x12   :  { %508 = vmatprep.subr.bf16.mxu0 %v541_v19 }
  0x15   :  { %509 = vmatpush3.bf16.msra.mxu0 %v541_v19 }
  0x16   :  { %510 = vmatprep.subr.bf16.mxu0 %v542_v20 }
  0x19   :  { %511 = vmatpush3.bf16.msra.mxu0 %v542_v20 }
  0x1a   :  { %512 = vmatprep.subr.bf16.mxu0 %v543_v21 }
  0x1d   :  { %513 = vmatpush3.bf16.msra.mxu0 %v543_v21 }
  0x1e   :  { %514 = vmatprep.subr.bf16.mxu0 %v544_v22 }
  0x21   :  { %515 = vmatpush3.bf16.msra.mxu0 %v544_v22 }
  0x24   :  { %517 = vmatmul.mubr.bf16.vlgmr.msra.gmra.mxu0 %v36_v23 }
  0xc6   :  { %v524_v5 = vpop.f32.mrf.mxu1 }
  0xc7   :  { %v271_v10 = vsel %vm267_vm1, %v524_v5, -inf }
  0xc8   :  { %v248_v6 = vpop.f32.mrf.mxu1 }
  0xc9   :  { %v268_v7 = vsel %vm267_vm1, %v248_v6, -inf }
  0xca   :  { %269 = vmax.xlane.f32.xlu0 %v268_v7  ;;  %v527_v8 = vpop.f32.mrf.mxu1 }
  0xcb   :  { %v277_v12 = vsel %vm267_vm1, %v527_v8, -inf }
  0xcc   :  { %v258_v9 = vpop.f32.mrf.mxu1 }
  0xcd   :  { %v274_v11 = vsel %vm267_vm1, %v258_v9, -inf }
  0xce   :  { %272 = vmax.xlane.f32.xlu0 %v271_v10  ;;  %275 = vmax.xlane.f32.xlu1 %v274_v11 }
  0xd2   :  { %278 = vmax.xlane.f32.xlu1 %v277_v12 }
  0xe4   :  { %v518_v47 = vpop.f32.mrf.mxu0 }
  0xe5   :  { %v152_v49 = vadd.f32 %v518_v47, %v32_v46 }
  0xe6   :  { %v135_v50 = vpop.f32.mrf.mxu0 }
  0xe7   :  { %157 = vst.msk [vmem:[#allocation2 + $0x10] sm:$0xff] %vm25_vm0, %v152_v49  ;;  %v150_v52 = vadd.f32 %v135_v50, %v30_v48 }
  0xe8   :  { %v519_v53 = vpop.f32.mrf.mxu0 }
  0xe9   :  { %155 = vst.msk [vmem:[#allocation2] sm:$0xff] %vm25_vm0, %v150_v52  ;;  %v153_v55 = vadd.f32 %v519_v53, %v33_v51 }
  0xea   :  { %v138_v56 = vpop.f32.mrf.mxu0 }
  0xeb   :  { %158 = vst.msk [vmem:[#allocation2 + $0x18] sm:$0xff] %vm25_vm0, %v153_v55  ;;  %v151_v57 = vadd.f32 %v138_v56, %v31_v54 }
  0xed   :  { %156 = vst.msk [vmem:[#allocation2 + $0x8] sm:$0xff] %vm25_vm0, %v151_v57 }
  0xee   :  { %v416_v19 = vld [vmem:[#allocation2 + $0x10] sm:$0xff] }
  0xf0   :  { %v414_v10 = vld [vmem:[#allocation2] sm:$0xff] }
  0xf2   :  { %v417_v14 = vld [vmem:[#allocation2 + $0x18] sm:$0xff] }
  0xf4   :  { %v415_v7 = vld [vmem:[#allocation2 + $0x8] sm:$0xff] }
 0x153   :  { %v270_v24 = vpop.xlane.xlu0 %269 }
 0x154   :  { %v280_v25 = vsub.f32 %v248_v6, %v270_v24 }
 0x156   :  { %v284_v26 = vmul.f32 1.442695, %v280_v25 }
 0x157   :  { %v273_v27 = vpop.xlane.xlu0 %272  ;;  %v276_v28 = vpop.xlane.xlu1 %275 }
 0x158   :  { %545 = vpow2.f32 %v284_v26  ;;  %v281_v29 = vsub.f32 %v524_v5, %v273_v27  ;;  %v282_v30 = vsub.f32 %v258_v9, %v276_v28 }
 0x15a   :  { %v286_v31 = vmul.f32 1.442695, %v281_v29  ;;  %v288_v32 = vmul.f32 1.442695, %v282_v30 }
 0x15b   :  { %v279_v33 = vpop.xlane.xlu1 %278 }
 0x15c   :  { %547 = vpow2.f32 %v286_v31  ;;  %v283_v34 = vsub.f32 %v527_v8, %v279_v33 }
 0x15d   :  { %549 = vpow2.f32 %v288_v32 }
 0x15e   :  { %v290_v35 = vmul.f32 1.442695, %v283_v34 }
 0x160   :  { %551 = vpow2.f32 %v290_v35 }
 0x165   :  { %v546_v36 = vpop.eup %545 }
 0x166   :  { %v292_v37 = vsel %vm267_vm1, %v546_v36, 0.0 }
 0x167   :  { %293 = vadd.xlane.f32.xlu0 %v292_v37 }
 0x169   :  { %v548_v38 = vpop.eup %547 }
 0x16a   :  { %v550_v39 = vpop.eup %549  ;;  %v295_v40 = vsel %vm267_vm1, %v548_v38, 0.0 }
 0x16b   :  { %296 = vadd.xlane.f32.xlu1 %v295_v40  ;;  %v298_v41 = vsel %vm267_vm1, %v550_v39, 0.0 }
 0x16c   :  { %299 = vadd.xlane.f32.xlu0 %v298_v41 }
 0x16d   :  { %v552_v42 = vpop.eup %551 }
 0x16e   :  { %v301_v43 = vsel %vm267_vm1, %v552_v42, 0.0 }
 0x16f   :  { %302 = vadd.xlane.f32.xlu1 %v301_v43 }
 0x1f0   :  { %v294_v58 = vpop.xlane.xlu0 %293 }
 0x1f1   :  { %553 = vrcp.f32 %v294_v58 }
 0x1f4   :  { %v297_v59 = vpop.xlane.xlu1 %296 }
 0x1f5   :  { %v300_v60 = vpop.xlane.xlu0 %299  ;;  %555 = vrcp.f32 %v297_v59 }
 0x1f6   :  { %557 = vrcp.f32 %v300_v60 }
 0x1f8   :  { %v303_v61 = vpop.xlane.xlu1 %302 }
 0x1f9   :  { %559 = vrcp.f32 %v303_v61 }
 0x1fe   :  { %v554_v62 = vpop.eup %553 }
 0x1ff   :  { %v305_v63 = vmul.f32 %v554_v62, %v546_v36 }
 0x201   :  { %530 = vmatprep.mubr.msk.f32.mxu1 %vm267_vm1, %v305_v63 }
 0x202   :  { %v556_v0 = vpop.eup %555 }
 0x203   :  { %v558_v1 = vpop.eup %557  ;;  %v307_v2 = vmul.f32 %v556_v0, %v548_v38 }
 0x204   :  { %v309_v3 = vmul.f32 %v558_v1, %v550_v39 }
 0x205   :  { %531 = vmatmul.mubr.msk.f32.vlgmr.msra.gmra.mxu1 %vm267_vm1, %v307_v2 }
 0x206   :  { %v560_v4 = vpop.eup %559  ;;  %533 = vmatprep.mubr.msk.f32.mxu1 %vm267_vm1, %v309_v3 }
 0x207   :  { %v311_v5 = vmul.f32 %v560_v4, %v552_v42 }
 0x209   :  { %534 = vmatmul.mubr.msk.f32.gmra.mxu1 %vm267_vm1, %v311_v5 }
 0x2c5   :  { %v532_v6 = vpop.f32.mrf.mxu1 }
 0x2c6   :  { %v419_v8 = vmul.f32 %v532_v6, %v415_v7 }
 0x2c7   :  { %v395_v9 = vpop.f32.mrf.mxu1 }
 0x2c8   :  { %v423_v11 = vadd.f32 %v419_v8, %v415_v7  ;;  %v418_v12 = vmul.f32 %v414_v10, %v395_v9 }
 0x2c9   :  { %v535_v13 = vpop.f32.mrf.mxu1 }
 0x2ca   :  { %v422_v15 = vadd.f32 %v418_v12, %v414_v10  ;;  %v421_v16 = vmul.f32 %v535_v13, %v417_v14  ;;  %v427_v17 = vmul.f32 %v423_v11, %v423_v11 }
 0x2cb   :  { %v405_v18 = vpop.f32.mrf.mxu1 }
 0x2cc   :  { %v425_v20 = vadd.f32 %v421_v16, %v417_v14  ;;  %v420_v21 = vmul.f32 %v416_v19, %v405_v18  ;;  %v433_v22 = vsel %vm25_vm0, %v427_v17, 0.0  ;;  %v426_v23 = vmul.f32 %v422_v15, %v422_v15 }
 0x2cd   :  { %434 = vadd.xlane.f32.xlu1 %v433_v22 }
 0x2ce   :  { %v424_v24 = vadd.f32 %v420_v21, %v416_v19  ;;  %v430_v25 = vsel %vm25_vm0, %v426_v23, 0.0  ;;  %v429_v26 = vmul.f32 %v425_v20, %v425_v20 }
 0x2cf   :  { %431 = vadd.xlane.f32.xlu0 %v430_v25 }
 0x2d0   :  { %v439_v27 = vsel %vm25_vm0, %v429_v26, 0.0  ;;  %v428_v28 = vmul.f32 %v424_v24, %v424_v24 }
 0x2d1   :  { %440 = vadd.xlane.f32.xlu1 %v439_v27 }
 0x2d2   :  { %v436_v29 = vsel %vm25_vm0, %v428_v28, 0.0 }
 0x2d3   :  { %437 = vadd.xlane.f32.xlu0 %v436_v29 }
 0x356   :  { %v435_v30 = vpop.xlane.xlu1 %434 }
 0x357   :  { %v443_v31 = vmax.f32 %v435_v30, 1e-24 }
 0x358   :  { %v432_v32 = vpop.xlane.xlu0 %431 }
 0x359   :  { %561 = vrsqrt.f32 %v443_v31  ;;  %v442_v33 = vmax.f32 %v432_v32, 1e-24 }
 0x35a   :  { %v441_v34 = vpop.xlane.xlu1 %440 }
 0x35b   :  { %563 = vrsqrt.f32 %v442_v33  ;;  %v445_v35 = vmax.f32 %v441_v34, 1e-24 }
 0x35c   :  { %v438_v36 = vpop.xlane.xlu0 %437 }
 0x35d   :  { %565 = vrsqrt.f32 %v445_v35  ;;  %v444_v37 = vmax.f32 %v438_v36, 1e-24 }
 0x35f   :  { %567 = vrsqrt.f32 %v444_v37 }
 0x366   :  { %v562_v38 = vpop.eup %561 }
 0x367   :  { %v451_v39 = vmul.f32 %v562_v38, %v423_v11 }
 0x368   :  { %v564_v40 = vpop.eup %563 }
 0x369   :  { %455 = vst.msk [vmem:[%s696_s5 + $0x8] sm:$0xff] %vm25_vm0, %v451_v39  ;;  %v450_v41 = vmul.f32 %v564_v40, %v422_v15 }
 0x36a   :  { %v566_v42 = vpop.eup %565 }
 0x36b   :  { %454 = vst.msk [vmem:[%s696_s5] sm:$0xff] %vm25_vm0, %v450_v41  ;;  %v453_v43 = vmul.f32 %v566_v42, %v425_v20 }
 0x36c   :  { %v568_v44 = vpop.eup %567 }
 0x36d   :  { %457 = vst.msk [vmem:[%s696_s5 + $0x18] sm:$0xff] %vm25_vm0, %v453_v43  ;;  %v452_v45 = vmul.f32 %v568_v44, %v424_v24 }
 0x36f   :  { %456 = vst.msk [vmem:[%s696_s5 + $0x10] sm:$0xff] %vm25_vm0, %v452_v45 }

// kernel: graph_conv_forward.4
= control target key start
LH: loop header
LB: loop body
LE: loop exit
PB: predicated region body
PF: predicated region fallthrough
CT: control target
= control target key end

     0   :  { %s1250_s0 = inlined_call_operand.vmem [shape: s32[2], index: 0, kind: input, shape index: {}]   ;;  %s1251_s2 = inlined_call_operand.vmem [shape: s32[1,256], index: 2, kind: input, shape index: {}]   ;;  %s1252_s3 = inlined_call_operand.vmem [shape: bf16[256,32], index: 3, kind: input, shape index: {}]   ;;  %s1253_s4 = inlined_call_operand.vmem [shape: f32[64,1], index: 4, kind: input, shape index: {}]   ;;  %s1254_s5 = inlined_call_operand.vmem [shape: f32[64,32], index: 5, kind: output, shape index: {0}]   ;;  %s1255_s6 = inlined_call_operand.vmem [shape: bf16[64,32], index: 6, kind: output, shape index: {1}]   ;;  %s1256_s1 = inlined_call_operand.vmem [shape: s32[2], index: 1, kind: input, shape index: {}]  }
   0x1   :  { %s12_s23 = sshll.u32 %s1250_s0, 4  ;;  %s16_s26 = sshll.u32 %s1256_s1, 4  ;;  %s13_s23 = int_to_ptr.vmem [resolvable:$true] %s12_s23  ;;  %s17_s26 = int_to_ptr.vmem [resolvable:$true] %s16_s26 }
   0x2   :  { %s1039_s27 = scalar_lea.vmem %s13_s23, 16  ;;  %p1044_p1 = scmp.lt.s32.totalorder %s13_s23, %s13_s23 }
   0x3   :  { %p1040_p0 = scmp.ne.s32.totalorder %s13_s23, %s1039_s27  ;;  %p1045_p2 = scmp.lt.s32.totalorder %s1039_s27, %s1039_s27 }
   0x5   :  { %p1046_p3 = por %p1045_p2, %p1044_p1 }
   0x7   :  { %p1047_p4 = pnand %p1046_p3, %p1040_p0 }
   0x9   :  { %1050 = shalt.err (!%p1047_p4)  }
   0xa   :  { %s1089_s28 = smov [#allocation4]   ;;  %s1051_s29 = scalar_lea.vmem %s17_s26, 16 }
   0xb   :  { %15 = dma.vmem_to_smem %s13_s23, 16, %s1089_s28, [#allocation3] }
   0xc   :  { %p1052_p5 = scmp.ne.s32.totalorder %s17_s26, %s1051_s29  ;;  %p1056_p6 = scmp.lt.s32.totalorder %s17_s26, %s17_s26 }
   0xd   :  { %p1057_p7 = scmp.lt.s32.totalorder %s1051_s29, %s1051_s29 }
   0xf   :  { %p1058_p8 = por %p1057_p7, %p1056_p6 }
  0x11   :  { %p1059_p9 = pnand %p1058_p8, %p1052_p5 }
  0x13   :  { %1062 = shalt.err (!%p1059_p9)  }
  0x14   :  { %s1090_s0 = smov [#allocation5]  }
  0x15   :  { %19 = dma.vmem_to_smem %s17_s26, 16, %s1090_s0, [#allocation3] }
  0x16   :  { %1075 = dma.done.wait [#allocation3], 32 }
  0x17   :  { %1076 = vsyncadd [#allocation3], 4294967264 }
  0x18   :  { %21 = sfence }
  0x19   :  { %s1135_s1 = smov 0   ;;  %s1137_s30 = smov 0  }
  0x1a   :  { %s1139_s7 = smov 0  }
  0x1b LB: > { %s39_s8 = sadd.s32 1, %s1083_s30  ;;  %p863_p10 = scmp.ge.s32.totalorder %s1087_s7, 1  ;;  %s1087_s7 = sphi %s1139_s7, %s27_s7   ;;  %s1083_s30 = sphi %s1137_s30, %s1258_s30   ;;  %s1079_s1 = sphi %s1135_s1, %s1257_s1  }
  0x1c   : > { %p41_p11 = scmp.ge.s32.totalorder %s39_s8, 2  ;;  %p275_p12 = scmp.lt.s32.totalorder %s1087_s7, 3 }
  0x1e   : > { %s1260_s8 = smov (%p41_p11, %s39_s8), 0  ;;  %p276_p13 = pnand %p863_p10, %p275_p12 }
  0x1f   : > { %s871_s9 = sshll.u32 (!%p276_p13), %s1079_s1, 2  ;;  %s332_s10 = sld [smem:[#allocation5 + %s1079_s1]] (!%p276_p13) }
  0x20   : > { %279 = sbr.rel (%p276_p13) target bundleno = 589 (0x24d), region = 32  ;;  %p375_p0 = scmp.lt.s32.totalorder (!%p276_p13), %s871_s9, 7 }
  0x21   : > { %s331_s11 = sld [smem:[#allocation4 + %s1079_s1]] (!%p276_p13) }
  0x22   : > { %s353_s12 = sld [smem:[#allocation5 + %s1079_s1]] (!%p276_p13) }
  0x23   : > { %s402_s13 = sld [smem:[#allocation5 + %s1079_s1]] (!%p276_p13) }
  0x24   : > { %s352_s27 = sld [smem:[#allocation4 + %s1079_s1]] (!%p276_p13) }
  0x25   : > { %vm397_vm0 = vcmask 261120   ;;  %v1091_v0 = vmov 0.0   ;;  %s1262_s9 = smov (!%p375_p0, %s871_s9), 7  ;;  %s864_s16 = sadd.s32 4294967295, %s332_s10 }
  0x26   : > { %398 = vst.msk [vmem:[#allocation2] sm:$0xff] %vm397_vm0, %v1091_v0  ;;  %399 = vst.msk [vmem:[#allocation2 + $0x8] sm:$0xff] %vm397_vm0, %v1091_v0  ;;  %s872_s14 = sshll.u32 %s1262_s9, 3  ;;  %s876_s15 = sshll.u32 %s1262_s9, 2 }
  0x27   : > { %400 = vst.msk [vmem:[#allocation2 + $0x10] sm:$0xff] %vm397_vm0, %v1091_v0  ;;  %401 = vst.msk [vmem:[#allocation2 + $0x18] sm:$0xff] %vm397_vm0, %v1091_v0  ;;  %s1167_s19 = scalar_lea.vmem %s1253_s4, %s872_s14  ;;  %p334_p1 = scmp.gt.s32.totalorder %s864_s16, 0 }
  0x28   : > { %s1172_s22 = scalar_lea.vmem %s1254_s5, %s872_s14  ;;  %s867_s23 = sadd.s32 4294967295, %s353_s12 }
  0x29   : > { %s1177_s26 = scalar_lea.vmem %s1255_s6, %s876_s15  ;;  %s1264_s16 = smov (!%p334_p1, %s864_s16), 0 }
  0x2a   : > { %p355_p2 = scmp.gt.s32.totalorder %s867_s23, 0  ;;  %s1266_s16 = smov (%p334_p1, %s1264_s16), 0 }
  0x2b   : > { %s338_s28 = sadd.s32 %s1266_s16, %s331_s11  ;;  %p878_p5 = scmp.le.s32.totalorder %s402_s13, 0 }
  0x2c   : > { %s1268_s23 = smov (!%p355_p2, %s867_s23), 0  ;;  %s866_s29 = sshll.u32 %s338_s28, 1 }
  0x2d   : > { %p340_p3 = scmp.lt.s32.totalorder %s866_s29, 1  ;;  %s1270_s23 = smov (%p355_p2, %s1268_s23), 0 }
  0x2e   : > { %s359_s0 = sadd.s32 %s1270_s23, %s352_s27  ;;  %s879_s11 = sshll.u32 (!%p878_p5), %s1079_s1, 5 }
  0x2f   : > { %s1272_s29 = smov (!%p340_p3, %s866_s29), 1  ;;  %s869_s14 = sshll.u32 %s359_s0, 5 }
  0x30   : > { %s342_s12 = scalar_lea.vmem %s1251_s2, %s1272_s29  ;;  %p361_p4 = scmp.lt.s32.totalorder %s869_s14, 31 }
  0x31   : > { %406 = sbr.rel (%p878_p5) target bundleno = 291 (0x123), region = 40 }
  0x32   : > { %s1274_s14 = smov (!%p361_p4, %s869_s14), 31 }
  0x33   : > { %s870_s15 = sshll.u32 %s1274_s14, 2 }
  0x34   : > { %s1189_s20 = scalar_lea.vmem %s1252_s3, %s870_s15 }
  0x36   : > { %v1013_v1 = vld [vmem:[%s1189_s20 + $0x78] sm:$0xff]   ;;  %v1015_v3 = vld [vmem:[%s1189_s20 + $0x70] sm:$0xff]   ;;  %v1017_v5 = vld [vmem:[%s1189_s20 + $0x68] sm:$0xff]   ;;  %v411_v7 = vlaneseq  ;;  %v409_v12 = vstv %s879_s11  ;;  %v1092_v28 = vmov 1.0|1.0  }
  0x37   : > { %v1014_v2 = vld [vmem:[%s1189_s20 + $0x38] sm:$0xff]   ;;  %940 = vmatprep.subr.bf16.mxu0 %v1013_v1  ;;  %968 = vmatprep.subr.bf16.mxu1 %v1013_v1  ;;  %v1016_v4 = vld [vmem:[%s1189_s20 + $0x30] sm:$0xff]   ;;  %v1018_v6 = vld [vmem:[%s1189_s20 + $0x28] sm:$0xff]  }
  0x38   : > { %941 = vmatpush3.bf16.msra.mxu0 %v1014_v2  ;;  %976 = vmatpush3.bf16.msra.mxu1 %v1014_v2  ;;  %v1019_v8 = vld [vmem:[%s1189_s20 + $0x60] sm:$0xff]   ;;  %v412_v10 = vshrl.u32 %v411_v7, 7  ;;  %v1021_v11 = vld [vmem:[%s1189_s20 + $0x58] sm:$0xff]   ;;  %v1023_v15 = vld [vmem:[%s1189_s20 + $0x50] sm:$0xff]  }
  0x39   : > { %942 = vmatprep.subr.bf16.mxu0 %v1015_v3  ;;  %969 = vmatprep.subr.bf16.mxu1 %v1015_v3  ;;  %v1020_v9 = vld [vmem:[%s1189_s20 + $0x20] sm:$0xff]   ;;  %v1022_v13 = vld [vmem:[%s1189_s20 + $0x18] sm:$0xff]   ;;  %v1024_v21 = vld [vmem:[%s1189_s20 + $0x10] sm:$0xff]  }
  0x3a   : > { %v422_v14 = vsub.s32 1, %v412_v10  ;;  %v407_v16 = vld [vmem:[%s342_s12] sm:$0x3]  ;;  %v413_v18 = vadd.s32 8, %v412_v10  ;;  %v414_v19 = vadd.s32 16, %v412_v10  ;;  %v415_v20 = vadd.s32 24, %v412_v10 }
  0x3b   : > { %v410_v17 = vsub.s32 %v407_v16, %v409_v12  ;;  %v418_v23 = vsub.s32 0, %v412_v10  ;;  %v1025_v24 = vld [vmem:[%s1189_s20 + $0x48] sm:$0xff]   ;;  %v1027_v27 = vld [vmem:[%s1189_s20 + $0x40] sm:$0xff]   ;;  %v454_v34 = vld [vmem:[#allocation2 + $0x10] sm:$0xff] }
  0x3c   : > { %943 = vmatpush3.bf16.msra.mxu0 %v1016_v4  ;;  %977 = vmatpush3.bf16.msra.mxu1 %v1016_v4  ;;  %v1026_v25 = vld [vmem:[%s1189_s20 + $0x8] sm:$0xff]   ;;  %v1028_v29 = vld [vmem:[%s1189_s20] sm:$0xff]   ;;  %v455_v44 = vld [vmem:[#allocation2 + $0x18] sm:$0xff] }
  0x3d   : > { %944 = vmatprep.subr.bf16.mxu0 %v1017_v5  ;;  %970 = vmatprep.subr.bf16.mxu1 %v1017_v5  ;;  %v423_v22 = vrot.slane %v410_v17, %v422_v14  ;;  %v419_v26 = vrot.slane %v410_v17, %v418_v23  ;;  %v452_v32 = vld [vmem:[#allocation2] sm:$0xff]  ;;  %v453_v42 = vld [vmem:[#allocation2 + $0x8] sm:$0xff] }
  0x3f   : > { %vm425_vm1 = vcmp.eq.s32.totalorder %v412_v10, %v423_v22  ;;  %vm427_vm2 = vcmp.eq.s32.totalorder %v413_v18, %v423_v22  ;;  %vm429_vm3 = vcmp.eq.s32.totalorder %v414_v19, %v423_v22  ;;  %vm431_vm4 = vcmp.eq.s32.totalorder %v415_v20, %v423_v22 }
  0x40   : > { %945 = vmatpush3.bf16.msra.mxu0 %v1018_v6  ;;  %978 = vmatpush3.bf16.msra.mxu1 %v1018_v6  ;;  %vm904_vm5 = vmpackc.low %vm427_vm2, %vm425_vm1  ;;  %vm424_vm7 = vcmp.eq.s32.totalorder %v412_v10, %v419_v26  ;;  %vm426_vm8 = vcmp.eq.s32.totalorder %v413_v18, %v419_v26  ;;  %vm428_vm9 = vcmp.eq.s32.totalorder %v414_v19, %v419_v26 }
  0x41   : > { %946 = vmatprep.subr.bf16.mxu0 %v1019_v8  ;;  %971 = vmatprep.subr.bf16.mxu1 %v1019_v8  ;;  %vm908_vm6 = vmpackc.low %vm431_vm4, %vm429_vm3  ;;  %vm430_vm10 = vcmp.eq.s32.totalorder %v415_v20, %v419_v26 }
  0x42   : > { %905 = vmatprep.mubr.msk.bf16.mxu0 %vm904_vm5, %v1092_v28  ;;  %909 = vmatprep.mubr.msk.bf16.mxu1 %vm908_vm6, %v1092_v28  ;;  %vm906_vm11 = vmpackc.low %vm426_vm8, %vm424_vm7 }
  0x43   : > { %vm910_vm12 = vmpackc.low %vm430_vm10, %vm428_vm9 }
  0x44   : > { %947 = vmatpush3.bf16.msra.mxu0 %v1020_v9  ;;  %979 = vmatpush3.bf16.msra.mxu1 %v1020_v9 }
  0x45   : > { %948 = vmatprep.subr.bf16.mxu0 %v1021_v11  ;;  %972 = vmatprep.subr.bf16.mxu1 %v1021_v11 }
  0x48   : > { %949 = vmatpush3.bf16.msra.mxu0 %v1022_v13  ;;  %980 = vmatpush3.bf16.msra.mxu1 %v1022_v13 }
  0x49   : > { %950 = vmatprep.subr.bf16.mxu0 %v1023_v15  ;;  %973 = vmatprep.subr.bf16.mxu1 %v1023_v15 }
  0x4c   : > { %951 = vmatpush3.bf16.msra.mxu0 %v1024_v21  ;;  %981 = vmatpush3.bf16.msra.mxu1 %v1024_v21 }
  0x4d   : > { %952 = vmatprep.subr.bf16.mxu0 %v1025_v24  ;;  %974 = vmatprep.subr.bf16.mxu1 %v1025_v24 }
  0x50   : > { %953 = vmatpush3.bf16.msra.mxu0 %v1026_v25  ;;  %982 = vmatpush3.bf16.msra.mxu1 %v1026_v25 }
  0x51   : > { %954 = vmatprep.subr.bf16.mxu0 %v1027_v27  ;;  %975 = vmatprep.subr.bf16.mxu1 %v1027_v27 }
  0x54   : > { %955 = vmatpush3.bf16.msra.mxu0 %v1028_v29  ;;  %983 = vmatpush3.bf16.msra.mxu1 %v1028_v29 }
  0x57   : > { %907 = vmatmul.mubr.msk.bf16.vlgmr.msra.gmra.mxu0 %vm906_vm11, %v1092_v28  ;;  %911 = vmatmul.mubr.msk.bf16.vlgmr.msra.gmra.mxu1 %vm910_vm12, %v1092_v28 }
 0x117   : > { %v956_v30 = vpop.f32.mrf.mxu0  ;;  %v962_v31 = vpop.f32.mrf.mxu1 }
 0x119   : > { %v957_v33 = vpop.f32.mrf.mxu0  ;;  %v963_v35 = vpop.f32.mrf.mxu1 }
 0x11a   : > { %v958_v36 = vadd.f32 %v957_v33, %v956_v30  ;;  %v964_v37 = vadd.f32 %v963_v35, %v962_v31 }
 0x11b   : > { %v959_v38 = vpop.f32.mrf.mxu0  ;;  %v965_v39 = vpop.f32.mrf.mxu1 }
 0x11c   : > { %v633_v40 = vadd.f32 %v958_v36, %v452_v32  ;;  %v635_v41 = vadd.f32 %v964_v37, %v454_v34 }
 0x11d   : > { %v960_v43 = vpop.f32.mrf.mxu0  ;;  %v966_v45 = vpop.f32.mrf.mxu1 }
 0x11e   : > { %638 = vst.msk [vmem:[#allocation2] sm:$0xff] %vm397_vm0, %v633_v40  ;;  %640 = vst.msk [vmem:[#allocation2 + $0x10] sm:$0xff] %vm397_vm0, %v635_v41  ;;  %v961_v46 = vadd.f32 %v960_v43, %v959_v38  ;;  %v967_v47 = vadd.f32 %v966_v45, %v965_v39 }
 0x120   : > { %v634_v48 = vadd.f32 %v961_v46, %v453_v42  ;;  %v636_v49 = vadd.f32 %v967_v47, %v455_v44 }
 0x122   : > { %639 = vst.msk [vmem:[#allocation2 + $0x8] sm:$0xff] %vm397_vm0, %v634_v48  ;;  %641 = vst.msk [vmem:[#allocation2 + $0x18] sm:$0xff] %vm397_vm0, %v636_v49 }
 0x123 PF: > { %v651_v50 = vld [vmem:[%s1167_s19 + $0x10] sm:$0xff]  ;;  %v649_v51 = vld [vmem:[%s1167_s19] sm:$0xff]  ;;  %v1093_v52 = vmov 0   ;;  %v652_v53 = vld [vmem:[%s1167_s19 + $0x18] sm:$0xff]  ;;  %vm726_vm13 = vcmask 257024  }
 0x124   : > { %1030 = vset.pattern.permute.xlu1 %v1093_v52  ;;  %1029 = vset.pattern.permute.xlu0 %v1093_v52  ;;  %v650_v54 = vld [vmem:[%s1167_s19 + $0x8] sm:$0xff] }
 0x125   : > { %665 = vperm.xlu1 %1030, %v651_v50   ;;  %655 = vperm.xlu0 %1029, %v649_v51   ;;  %v647_v55 = vld [vmem:[#allocation2 + $0x10] sm:$0xff]  ;;  %v645_v56 = vld [vmem:[#allocation2] sm:$0xff] }
 0x129   : > { %670 = vperm.xlu1 %1030, %v652_v53   ;;  %660 = vperm.xlu0 %1029, %v650_v54   ;;  %v648_v61 = vld [vmem:[#allocation2 + $0x18] sm:$0xff]  ;;  %v646_v62 = vld [vmem:[#allocation2 + $0x8] sm:$0xff] }
 0x1a0   : > { %v666_v57 = vpop.permute.xlu1 %665  ;;  %v656_v58 = vpop.permute.xlu0 %655 }
 0x1a1   : > { %v675_v59 = vmul.f32 %v666_v57, %v647_v55  ;;  %v673_v60 = vmul.f32 %v656_v58, %v645_v56 }
 0x1a3   : > { %v677_v63 = vmul.f32 %v673_v60, %v673_v60  ;;  %v679_v0 = vmul.f32 %v675_v59, %v675_v59 }
 0x1a4   : > { %v671_v1 = vpop.permute.xlu1 %670  ;;  %v661_v2 = vpop.permute.xlu0 %660 }
 0x1a5   : > { %v676_v3 = vmul.f32 %v671_v1, %v648_v61  ;;  %v674_v4 = vmul.f32 %v661_v2, %v646_v62  ;;  %v682_v5 = vsel %vm397_vm0, %v677_v63, 0.0  ;;  %v688_v7 = vsel %vm397_vm0, %v679_v0, 0.0 }
 0x1a6   : > { %683 = vadd.xlane.f32.xlu0 %v682_v5 }
 0x1a7   : > { %v678_v6 = vmul.f32 %v674_v4, %v674_v4  ;;  %v680_v9 = vmul.f32 %v676_v3, %v676_v3 }
 0x1a9   : > { %v685_v8 = vsel %vm397_vm0, %v678_v6, 0.0  ;;  %v691_v10 = vsel %vm397_vm0, %v680_v9, 0.0 }
 0x1aa   : > { %686 = vadd.xlane.f32.xlu1 %v685_v8  ;;  %689 = vadd.xlane.f32.xlu0 %v688_v7 }
 0x1ae   : > { %692 = vadd.xlane.f32.xlu0 %v691_v10 }
 0x22f   : > { %v684_v11 = vpop.xlane.xlu0 %683 }
 0x230   : > { %v694_v12 = vmax.f32 %v684_v11, 1e-24 }
 0x232   : > { %1031 = vrsqrt.f32 %v694_v12 }
 0x233   : > { %v687_v13 = vpop.xlane.xlu1 %686  ;;  %v690_v14 = vpop.xlane.xlu0 %689 }
 0x234   : > { %v695_v15 = vmax.f32 %v687_v13, 1e-24  ;;  %v696_v16 = vmax.f32 %v690_v14, 1e-24 }
 0x236   : > { %1033 = vrsqrt.f32 %v695_v15 }
 0x237   : > { %1035 = vrsqrt.f32 %v696_v16  ;;  %v693_v17 = vpop.xlane.xlu0 %692 }
 0x238   : > { %v697_v18 = vmax.f32 %v693_v17, 1e-24 }
 0x23a   : > { %1037 = vrsqrt.f32 %v697_v18 }
 0x23f   : > { %v1032_v19 = vpop.eup %1031 }
 0x240   : > { %v702_v20 = vmul.f32 %v1032_v19, %v673_v60 }
 0x242   : > { %706 = vst.msk [vmem:[%s1172_s22] sm:$0xff] %vm397_vm0, %v702_v20  ;;  %v936_v21 = vpack.c.bf16 %v702_v20, %v702_v20 }
 0x243   : > { %v1034_v22 = vpop.eup %1033 }
 0x244   : > { %v1036_v23 = vpop.eup %1035  ;;  %727 = vst.msk [vmem:[%s1177_s26] sm:$0xf] %vm726_vm13, %v936_v21  ;;  %v703_v24 = vmul.f32 %v1034_v22, %v674_v4 }
 0x245   : > { %v704_v25 = vmul.f32 %v1036_v23, %v675_v59 }
 0x246   : > { %707 = vst.msk [vmem:[%s1172_s22 + $0x8] sm:$0xff] %vm397_vm0, %v703_v24  ;;  %v937_v26 = vpack.c.bf16 %v703_v24, %v703_v24 }
 0x247   : > { %v1038_v27 = vpop.eup %1037  ;;  %708 = vst.msk [vmem:[%s1172_s22 + $0x10] sm:$0xff] %vm397_vm0, %v704_v25  ;;  %v938_v28 = vpack.c.bf16 %v704_v25, %v704_v25 }
 0x248   : > { %728 = vst.msk [vmem:[%s1177_s26 + $0x4] sm:$0xf] %vm726_vm13, %v937_v26  ;;  %v705_v29 = vmul.f32 %v1038_v27, %v676_v3 }
 0x249   : > { %729 = vst.msk [vmem:[%s1177_s26 + $0x8] sm:$0xf] %vm726_vm13, %v938_v28 }
 0x24a   : > { %709 = vst.msk [vmem:[%s1172_s22 + $0x18] sm:$0xff] %vm397_vm0, %v705_v29  ;;  %v939_v30 = vpack.c.bf16 %v705_v29, %v705_v29 }
 0x24c   : > { %730 = vst.msk [vmem:[%s1177_s26 + $0xc] sm:$0xf] %vm726_vm13, %v939_v30 }
 0x24d PF: > { %s27_s7 = sadd.s32 1, %s1087_s7   ;;  %s1257_s1 = smov %s1083_s30 }
 0x24e   : > { %p24_p6 = scmp.ge.s32.totalorder %s27_s7, 4   ;;  %s1258_s30 = smov %s1260_s8 }
 0x250   :  { %26 = sbr.rel (!%p24_p6) target bundleno = 27 (0x1b), region = 92 }

// kernel: graph_conv_forward.6
= control target key start
LH: loop header
LB: loop body
LE: loop exit
PB: predicated region body
PF: predicated region fallthrough
CT: control target
= control target key end

     0   :  { %s1445_s0 = inlined_call_operand.vmem [shape: s32[2], index: 0, kind: input, shape index: {}]   ;;  %s1446_s2 = inlined_call_operand.vmem [shape: s32[1,256], index: 2, kind: input, shape index: {}]   ;;  %s1447_s3 = inlined_call_operand.vmem [shape: bf16[256,32], index: 3, kind: input, shape index: {}]   ;;  %s1448_s4 = inlined_call_operand.vmem [shape: f32[64,1], index: 4, kind: input, shape index: {}]   ;;  %s1449_s5 = inlined_call_operand.vmem [shape: f32[64,32], index: 5, kind: output, shape index: {0}]   ;;  %s1450_s6 = inlined_call_operand.hbm [shape: bf16[64,32], index: 6, kind: output, shape index: {1}]   ;;  %s1451_s1 = inlined_call_operand.vmem [shape: s32[2], index: 1, kind: input, shape index: {}]  }
   0x1   :  { %1454 = sst [smem:[#allocation11_spill]] %s1448_s4  ;;  %s12_s23 = sshll.u32 %s1445_s0, 4  ;;  %s13_s23 = int_to_ptr.vmem [resolvable:$true] %s12_s23 }
   0x2   :  { %1455 = sst [smem:[#allocation12_spill]] %s1449_s5  ;;  %s16_s26 = sshll.u32 %s1451_s1, 4  ;;  %s17_s26 = int_to_ptr.vmem [resolvable:$true] %s16_s26 }
   0x3   :  { %s1092_s27 = scalar_lea.vmem %s13_s23, 16  ;;  %p1097_p1 = scmp.lt.s32.totalorder %s13_s23, %s13_s23 }
   0x4   :  { %p1093_p0 = scmp.ne.s32.totalorder %s13_s23, %s1092_s27  ;;  %p1098_p2 = scmp.lt.s32.totalorder %s1092_s27, %s1092_s27 }
   0x6   :  { %p1099_p3 = por %p1098_p2, %p1097_p1 }
   0x8   :  { %p1100_p4 = pnand %p1099_p3, %p1093_p0 }
   0xa   :  { %1103 = shalt.err (!%p1100_p4)  }
   0xb   :  { %s1196_s28 = smov [#allocation4]   ;;  %s1104_s29 = scalar_lea.vmem %s17_s26, 16 }
   0xc   :  { %15 = dma.vmem_to_smem %s13_s23, 16, %s1196_s28, [#allocation3] }
   0xd   :  { %p1105_p5 = scmp.ne.s32.totalorder %s17_s26, %s1104_s29  ;;  %p1109_p6 = scmp.lt.s32.totalorder %s17_s26, %s17_s26 }
   0xe   :  { %p1110_p7 = scmp.lt.s32.totalorder %s1104_s29, %s1104_s29 }
  0x10   :  { %p1111_p8 = por %p1110_p7, %p1109_p6 }
  0x12   :  { %p1112_p9 = pnand %p1111_p8, %p1105_p5 }
  0x14   :  { %1115 = shalt.err (!%p1112_p9)  }
  0x15   :  { %s1197_s0 = smov [#allocation5]  }
  0x16   :  { %19 = dma.vmem_to_smem %s17_s26, 16, %s1197_s0, [#allocation3] }
  0x17   :  { %1166 = dma.done.wait [#allocation3], 32 }
  0x18   :  { %1167 = vsyncadd [#allocation3], 4294967264 }
  0x19   :  { %21 = sfence }
  0x1a   :  { %22 = vsyncpa [#allocation7], 0 }
  0x1b   :  { %24 = vsyncpa [#allocation7 + $0x1], 0  ;;  %s1245_s1 = smov 0   ;;  %s1247_s30 = smov 0  }
  0x1c   :  { %s1249_s7 = smov 0   ;;  %s1251_s8 = smov 0  }
  0x1d   :  { %s1253_s9 = smov 0   ;;  %s1255_s10 = smov 0  }
  0x1e LB: > { %s868_s11 = sadd.s32 4294967295, %s1194_s10   ;;  %s869_s12 = sadd.s32 4294967294, %s1194_s10   ;;  %s1194_s10 = sphi %s1255_s10, %s30_s10   ;;  %s1190_s9 = sphi %s1253_s9, %s1467_s9   ;;  %s1186_s8 = sphi %s1251_s8, %s1466_s8   ;;  %s1182_s7 = sphi %s1249_s7, %s1465_s7   ;;  %s1178_s30 = sphi %s1247_s30, %s1464_s30   ;;  %s1174_s1 = sphi %s1245_s1, %s1463_s1  }
  0x1f   : > { %s42_s13 = sadd.s32 1, %s1190_s9  ;;  %s185_s14 = sadd.s32 1, %s1182_s7 }
  0x20   : > { %p44_p10 = scmp.ge.s32.totalorder %s42_s13, 2  ;;  %p195_p11 = scmp.ne.s32.totalorder %s1182_s7, %s1178_s30 }
  0x21   : > { %p196_p12 = scmp.eq.s32.totalorder %s868_s11, 1  ;;  %p201_p13 = scmp.ne.s32.totalorder %s1178_s30, %s1174_s1 }
  0x22   : > { %s1469_s13 = smov (%p44_p10, %s42_s13), 0  ;;  %p202_p1 = scmp.eq.s32.totalorder %s869_s12, 1 }
  0x23   : > { %1456 = sst [smem:[#allocation10_spill]] %s1469_s13  ;;  %p1285_p0 = por %p196_p12, %p195_p11 }
  0x24   : > { %s182_s16 = ssub.s32 %s1190_s9, %s1469_s13  ;;  %p880_p2 = scmp.ge.s32.totalorder %s1194_s10, 1 }
  0x25   : > { %p183_p3 = scmp.eq.s32.totalorder %s182_s16, 0  ;;  %p1292_p4 = por %p202_p1, %p201_p13 }
  0x26   : > { %p278_p5 = scmp.lt.s32.totalorder %s1194_s10, 3 }
  0x27   : > { %s1298_s18 = scalar_select %p183_p3, %s1182_s7, %s185_s14  }
  0x28   : > { %p279_p6 = pnand %p880_p2, %p278_p5 }
  0x29   : > { %s1452_s19 = sand.u32 (!%p279_p6), 1, %s1178_s30   ;;  %s335_s21 = sld [smem:[#allocation5 + %s1186_s8]] (!%p279_p6) }
  0x2a   : > { %282 = sbr.rel (%p279_p6) target bundleno = 614 (0x266), region = 32  ;;  %s1303_s20 = sshll.u32 (!%p279_p6), %s1452_s19, 4 }
  0x2b   : > { %s356_s22 = sld [smem:[#allocation5 + %s1186_s8]] (!%p279_p6)  ;;  %s889_s23 = sshll.u32 (!%p279_p6), %s1186_s8, 2 }
  0x2c   : > { %p378_p7 = scmp.lt.s32.totalorder (!%p279_p6), %s889_s23, 7  ;;  %s400_s24 = sld [smem:[#allocation5 + %s1186_s8]] (!%p279_p6) }
  0x2d   : > { %s334_s25 = sld [smem:[#allocation4 + %s1186_s8]] (!%p279_p6) }
  0x2e   : > { %s355_s27 = sld [smem:[#allocation4 + %s1186_s8]] (!%p279_p6) }
  0x2f   : > { %vm395_vm0 = vcmask 261120   ;;  %v1198_v0 = vmov 0.0   ;;  %s1471_s23 = smov (!%p378_p7, %s889_s23), 7  ;;  %s882_s26 = sadd.s32 4294967295, %s335_s21 }
  0x30   : > { %396 = vst.msk [vmem:[#allocation2] sm:$0xff] %vm395_vm0, %v1198_v0  ;;  %397 = vst.msk [vmem:[#allocation2 + $0x8] sm:$0xff] %vm395_vm0, %v1198_v0  ;;  %p337_p8 = scmp.gt.s32.totalorder %s882_s26, 0  ;;  %s890_s28 = sshll.u32 %s1471_s23, 3 }
  0x31   : > { %398 = vst.msk [vmem:[#allocation2 + $0x10] sm:$0xff] %vm395_vm0, %v1198_v0  ;;  %399 = vst.msk [vmem:[#allocation2 + $0x18] sm:$0xff] %vm395_vm0, %v1198_v0  ;;  %s885_s29 = sadd.s32 4294967295, %s356_s22  ;;  %s1459_s4 = sld [smem:[#allocation11_spill]] }
  0x32   : > { %s1473_s26 = smov (!%p337_p8, %s882_s26), 0  ;;  %p358_p9 = scmp.gt.s32.totalorder %s885_s29, 0 }
  0x33   : > { %s1460_s5 = sld [smem:[#allocation12_spill]]  ;;  %s1475_s26 = smov (%p337_p8, %s1473_s26), 0 }
  0x34   : > { %s1477_s29 = smov (!%p358_p9, %s885_s29), 0  ;;  %s341_s21 = sadd.s32 %s1475_s26, %s334_s25 }
  0x35   : > { %s884_s13 = sshll.u32 %s341_s21, 1  ;;  %s1479_s29 = smov (%p358_p9, %s1477_s29), 0 }
  0x36   : > { %p343_p10 = scmp.lt.s32.totalorder %s884_s13, 1  ;;  %s362_s22 = sadd.s32 %s1479_s29, %s355_s27 }
  0x37   : > { %s1318_s12 = scalar_lea.vmem %s1459_s4, %s890_s28  ;;  %s887_s4 = sshll.u32 %s362_s22, 5 }
  0x38   : > { %s1481_s13 = smov (!%p343_p10, %s884_s13), 1  ;;  %p364_p11 = scmp.lt.s32.totalorder %s887_s4, 31 }
  0x39   : > { %s1323_s19 = scalar_lea.vmem %s1460_s5, %s890_s28  ;;  %s345_s11 = scalar_lea.vmem %s1446_s2, %s1481_s13 }
  0x3a   : > { %s1483_s4 = smov (!%p364_p11, %s887_s4), 31  ;;  %s1337_s25 = scalar_lea.vmem [#allocation6], %s1303_s20 }
  0x3b   : > { %s888_s14 = sshll.u32 %s1483_s4, 2  ;;  %p894_p12 = scmp.le.s32.totalorder %s400_s24, 0 }
  0x3c   : > { %s1334_s5 = scalar_lea.vmem %s1447_s3, %s888_s14  ;;  %s895_s4 = sshll.u32 (!%p894_p12), %s1186_s8, 5 }
  0x3d   : > { %404 = sbr.rel (%p894_p12) target bundleno = 303 (0x12f), region = 40 }
  0x42   : > { %v1066_v1 = vld [vmem:[%s1334_s5 + $0x78] sm:$0xff]   ;;  %v1068_v3 = vld [vmem:[%s1334_s5 + $0x70] sm:$0xff]   ;;  %v1070_v5 = vld [vmem:[%s1334_s5 + $0x68] sm:$0xff]   ;;  %v409_v7 = vlaneseq  ;;  %v407_v12 = vstv %s895_s4  ;;  %v1199_v28 = vmov 1.0|1.0  }
  0x43   : > { %v1067_v2 = vld [vmem:[%s1334_s5 + $0x38] sm:$0xff]   ;;  %960 = vmatprep.subr.bf16.mxu0 %v1066_v1  ;;  %988 = vmatprep.subr.bf16.mxu1 %v1066_v1  ;;  %v1069_v4 = vld [vmem:[%s1334_s5 + $0x30] sm:$0xff]   ;;  %v1071_v6 = vld [vmem:[%s1334_s5 + $0x28] sm:$0xff]  }
  0x44   : > { %961 = vmatpush3.bf16.msra.mxu0 %v1067_v2  ;;  %996 = vmatpush3.bf16.msra.mxu1 %v1067_v2  ;;  %v1072_v8 = vld [vmem:[%s1334_s5 + $0x60] sm:$0xff]   ;;  %v410_v10 = vshrl.u32 %v409_v7, 7  ;;  %v1074_v11 = vld [vmem:[%s1334_s5 + $0x58] sm:$0xff]   ;;  %v1076_v15 = vld [vmem:[%s1334_s5 + $0x50] sm:$0xff]  }
  0x45   : > { %962 = vmatprep.subr.bf16.mxu0 %v1068_v3  ;;  %989 = vmatprep.subr.bf16.mxu1 %v1068_v3  ;;  %v1073_v9 = vld [vmem:[%s1334_s5 + $0x20] sm:$0xff]   ;;  %v1075_v13 = vld [vmem:[%s1334_s5 + $0x18] sm:$0xff]   ;;  %v1077_v21 = vld [vmem:[%s1334_s5 + $0x10] sm:$0xff]  }
  0x46   : > { %v420_v14 = vsub.s32 1, %v410_v10  ;;  %v405_v16 = vld [vmem:[%s345_s11] sm:$0x3]  ;;  %v411_v18 = vadd.s32 8, %v410_v10  ;;  %v412_v19 = vadd.s32 16, %v410_v10  ;;  %v413_v20 = vadd.s32 24, %v410_v10 }
  0x47   : > { %v408_v17 = vsub.s32 %v405_v16, %v407_v12  ;;  %v416_v23 = vsub.s32 0, %v410_v10  ;;  %v1078_v24 = vld [vmem:[%s1334_s5 + $0x48] sm:$0xff]   ;;  %v1080_v27 = vld [vmem:[%s1334_s5 + $0x40] sm:$0xff]   ;;  %v452_v34 = vld [vmem:[#allocation2 + $0x10] sm:$0xff] }
  0x48   : > { %963 = vmatpush3.bf16.msra.mxu0 %v1069_v4  ;;  %997 = vmatpush3.bf16.msra.mxu1 %v1069_v4  ;;  %v1079_v25 = vld [vmem:[%s1334_s5 + $0x8] sm:$0xff]   ;;  %v1081_v29 = vld [vmem:[%s1334_s5] sm:$0xff]   ;;  %v453_v44 = vld [vmem:[#allocation2 + $0x18] sm:$0xff] }
  0x49   : > { %964 = vmatprep.subr.bf16.mxu0 %v1070_v5  ;;  %990 = vmatprep.subr.bf16.mxu1 %v1070_v5  ;;  %v421_v22 = vrot.slane %v408_v17, %v420_v14  ;;  %v417_v26 = vrot.slane %v408_v17, %v416_v23  ;;  %v450_v32 = vld [vmem:[#allocation2] sm:$0xff]  ;;  %v451_v42 = vld [vmem:[#allocation2 + $0x8] sm:$0xff] }
  0x4b   : > { %vm423_vm1 = vcmp.eq.s32.totalorder %v410_v10, %v421_v22  ;;  %vm425_vm2 = vcmp.eq.s32.totalorder %v411_v18, %v421_v22  ;;  %vm427_vm3 = vcmp.eq.s32.totalorder %v412_v19, %v421_v22  ;;  %vm429_vm4 = vcmp.eq.s32.totalorder %v413_v20, %v421_v22 }
  0x4c   : > { %965 = vmatpush3.bf16.msra.mxu0 %v1071_v6  ;;  %998 = vmatpush3.bf16.msra.mxu1 %v1071_v6  ;;  %vm920_vm5 = vmpackc.low %vm425_vm2, %vm423_vm1  ;;  %vm422_vm7 = vcmp.eq.s32.totalorder %v410_v10, %v417_v26  ;;  %vm424_vm8 = vcmp.eq.s32.totalorder %v411_v18, %v417_v26  ;;  %vm426_vm9 = vcmp.eq.s32.totalorder %v412_v19, %v417_v26 }
  0x4d   : > { %966 = vmatprep.subr.bf16.mxu0 %v1072_v8  ;;  %991 = vmatprep.subr.bf16.mxu1 %v1072_v8  ;;  %vm924_vm6 = vmpackc.low %vm429_vm4, %vm427_vm3  ;;  %vm428_vm10 = vcmp.eq.s32.totalorder %v413_v20, %v417_v26 }
  0x4e   : > { %921 = vmatprep.mubr.msk.bf16.mxu0 %vm920_vm5, %v1199_v28  ;;  %925 = vmatprep.mubr.msk.bf16.mxu1 %vm924_vm6, %v1199_v28  ;;  %vm922_vm11 = vmpackc.low %vm424_vm8, %vm422_vm7 }
  0x4f   : > { %vm926_vm12 = vmpackc.low %vm428_vm10, %vm426_vm9 }
  0x50   : > { %967 = vmatpush3.bf16.msra.mxu0 %v1073_v9  ;;  %999 = vmatpush3.bf16.msra.mxu1 %v1073_v9 }
  0x51   : > { %968 = vmatprep.subr.bf16.mxu0 %v1074_v11  ;;  %992 = vmatprep.subr.bf16.mxu1 %v1074_v11 }
  0x54   : > { %969 = vmatpush3.bf16.msra.mxu0 %v1075_v13  ;;  %1000 = vmatpush3.bf16.msra.mxu1 %v1075_v13 }
  0x55   : > { %970 = vmatprep.subr.bf16.mxu0 %v1076_v15  ;;  %993 = vmatprep.subr.bf16.mxu1 %v1076_v15 }
  0x58   : > { %971 = vmatpush3.bf16.msra.mxu0 %v1077_v21  ;;  %1001 = vmatpush3.bf16.msra.mxu1 %v1077_v21 }
  0x59   : > { %972 = vmatprep.subr.bf16.mxu0 %v1078_v24  ;;  %994 = vmatprep.subr.bf16.mxu1 %v1078_v24 }
  0x5c   : > { %973 = vmatpush3.bf16.msra.mxu0 %v1079_v25  ;;  %1002 = vmatpush3.bf16.msra.mxu1 %v1079_v25 }
  0x5d   : > { %974 = vmatprep.subr.bf16.mxu0 %v1080_v27  ;;  %995 = vmatprep.subr.bf16.mxu1 %v1080_v27 }
  0x60   : > { %975 = vmatpush3.bf16.msra.mxu0 %v1081_v29  ;;  %1003 = vmatpush3.bf16.msra.mxu1 %v1081_v29 }
  0x63   : > { %923 = vmatmul.mubr.msk.bf16.vlgmr.msra.gmra.mxu0 %vm922_vm11, %v1199_v28  ;;  %927 = vmatmul.mubr.msk.bf16.vlgmr.msra.gmra.mxu1 %vm926_vm12, %v1199_v28 }
 0x123   : > { %v976_v30 = vpop.f32.mrf.mxu0  ;;  %v982_v31 = vpop.f32.mrf.mxu1 }
 0x125   : > { %v977_v33 = vpop.f32.mrf.mxu0  ;;  %v983_v35 = vpop.f32.mrf.mxu1 }
 0x126   : > { %v978_v36 = vadd.f32 %v977_v33, %v976_v30  ;;  %v984_v37 = vadd.f32 %v983_v35, %v982_v31 }
 0x127   : > { %v979_v38 = vpop.f32.mrf.mxu0  ;;  %v985_v39 = vpop.f32.mrf.mxu1 }
 0x128   : > { %v631_v40 = vadd.f32 %v978_v36, %v450_v32  ;;  %v633_v41 = vadd.f32 %v984_v37, %v452_v34 }
 0x129   : > { %v980_v43 = vpop.f32.mrf.mxu0  ;;  %v986_v45 = vpop.f32.mrf.mxu1 }
 0x12a   : > { %636 = vst.msk [vmem:[#allocation2] sm:$0xff] %vm395_vm0, %v631_v40  ;;  %638 = vst.msk [vmem:[#allocation2 + $0x10] sm:$0xff] %vm395_vm0, %v633_v41  ;;  %v981_v46 = vadd.f32 %v980_v43, %v979_v38  ;;  %v987_v47 = vadd.f32 %v986_v45, %v985_v39 }
 0x12c   : > { %v632_v48 = vadd.f32 %v981_v46, %v451_v42  ;;  %v634_v49 = vadd.f32 %v987_v47, %v453_v44 }
 0x12e   : > { %637 = vst.msk [vmem:[#allocation2 + $0x8] sm:$0xff] %vm395_vm0, %v632_v48  ;;  %639 = vst.msk [vmem:[#allocation2 + $0x18] sm:$0xff] %vm395_vm0, %v634_v49 }
 0x12f PF: > { %v649_v50 = vld [vmem:[%s1318_s12 + $0x10] sm:$0xff]  ;;  %v647_v51 = vld [vmem:[%s1318_s12] sm:$0xff]  ;;  %v1200_v52 = vmov 0   ;;  %v650_v53 = vld [vmem:[%s1318_s12 + $0x18] sm:$0xff]  ;;  %vm724_vm13 = vcmask 257024   ;;  %s959_s5 = sshll.u32 %s1186_s8, 8 }
 0x130   : > { %1083 = vset.pattern.permute.xlu1 %v1200_v52  ;;  %1082 = vset.pattern.permute.xlu0 %v1200_v52  ;;  %v648_v54 = vld [vmem:[%s1318_s12 + $0x8] sm:$0xff]  ;;  %s752_s13 = sshll.u32 %s1337_s25, 4  ;;  %s1390_s29 = scalar_lea.hbm %s1450_s6, %s959_s5  ;;  %s1392_s13 = int_to_ptr.vmem [resolvable:$true] %s752_s13 }
 0x131   : > { %663 = vperm.xlu1 %1083, %v649_v50   ;;  %653 = vperm.xlu0 %1082, %v647_v51   ;;  %v645_v55 = vld [vmem:[#allocation2 + $0x10] sm:$0xff]  ;;  %v643_v56 = vld [vmem:[#allocation2] sm:$0xff]  ;;  %s1461_s8 = sand.u32 1, %s1178_s30   ;;  %s1116_s21 = scalar_lea.vmem %s1392_s13, 256 }
 0x132   : > { %s1400_s12 = scalar_lea.sflag [#allocation7], %s1461_s8  ;;  %p1117_p13 = scmp.ne.s32.totalorder %s1392_s13, %s1116_s21 }
 0x133   : > { %s1201_s22 = smov [#allocation6]  }
 0x134   : > { %p1118_p1 = pnand %p1117_p13, %p1285_p0  ;;  %s1120_s23 = sshll.u32 %s1201_s22, 4  ;;  %s1121_s23 = int_to_ptr.vmem [resolvable:$false] %s1120_s23 }
 0x135   : > { %668 = vperm.xlu1 %1083, %v650_v53   ;;  %658 = vperm.xlu0 %1082, %v648_v54   ;;  %v646_v61 = vld [vmem:[#allocation2 + $0x18] sm:$0xff]  ;;  %v644_v62 = vld [vmem:[#allocation2 + $0x8] sm:$0xff]  ;;  %s1122_s0 = scalar_lea.vmem %s1121_s23, 512  ;;  %p1123_p3 = scmp.lt.s32.totalorder %s1392_s13, %s1121_s23 }
 0x136   : > { %p1119_p2 = pneg %p1118_p1  ;;  %p1124_p5 = scmp.lt.s32.totalorder %s1122_s0, %s1116_s21 }
 0x138   : > { %p1125_p6 = por %p1124_p5, %p1123_p3 }
 0x13a   : > { %p1126_p7 = pnand %p1125_p6, %p1119_p2 }
 0x1ac   : > { %v664_v57 = vpop.permute.xlu1 %663  ;;  %v654_v58 = vpop.permute.xlu0 %653 }
 0x1ad   : > { %v673_v59 = vmul.f32 %v664_v57, %v645_v55  ;;  %v671_v60 = vmul.f32 %v654_v58, %v643_v56 }
 0x1af   : > { %v675_v63 = vmul.f32 %v671_v60, %v671_v60  ;;  %v677_v0 = vmul.f32 %v673_v59, %v673_v59 }
 0x1b0   : > { %v669_v1 = vpop.permute.xlu1 %668  ;;  %v659_v2 = vpop.permute.xlu0 %658 }
 0x1b1   : > { %v674_v3 = vmul.f32 %v669_v1, %v646_v61  ;;  %v672_v4 = vmul.f32 %v659_v2, %v644_v62  ;;  %v680_v5 = vsel %vm395_vm0, %v675_v63, 0.0  ;;  %v686_v7 = vsel %vm395_vm0, %v677_v0, 0.0 }
 0x1b2   : > { %681 = vadd.xlane.f32.xlu0 %v680_v5 }
 0x1b3   : > { %v676_v6 = vmul.f32 %v672_v4, %v672_v4  ;;  %v678_v9 = vmul.f32 %v674_v3, %v674_v3 }
 0x1b5   : > { %v683_v8 = vsel %vm395_vm0, %v676_v6, 0.0  ;;  %v689_v10 = vsel %vm395_vm0, %v678_v9, 0.0 }
 0x1b6   : > { %684 = vadd.xlane.f32.xlu1 %v683_v8  ;;  %687 = vadd.xlane.f32.xlu0 %v686_v7 }
 0x1ba   : > { %690 = vadd.xlane.f32.xlu0 %v689_v10 }
 0x23b   : > { %v682_v11 = vpop.xlane.xlu0 %681 }
 0x23c   : > { %v692_v12 = vmax.f32 %v682_v11, 1e-24 }
 0x23e   : > { %1084 = vrsqrt.f32 %v692_v12 }
 0x23f   : > { %v685_v13 = vpop.xlane.xlu1 %684  ;;  %v688_v14 = vpop.xlane.xlu0 %687 }
 0x240   : > { %v693_v15 = vmax.f32 %v685_v13, 1e-24  ;;  %v694_v16 = vmax.f32 %v688_v14, 1e-24 }
 0x242   : > { %1086 = vrsqrt.f32 %v693_v15 }
 0x243   : > { %1088 = vrsqrt.f32 %v694_v16  ;;  %v691_v17 = vpop.xlane.xlu0 %690 }
 0x244   : > { %v695_v18 = vmax.f32 %v691_v17, 1e-24 }
 0x246   : > { %1090 = vrsqrt.f32 %v695_v18 }
 0x24b   : > { %v1085_v19 = vpop.eup %1084 }
 0x24c   : > { %v700_v20 = vmul.f32 %v1085_v19, %v671_v60 }
 0x24e   : > { %704 = vst.msk [vmem:[%s1323_s19] sm:$0xff] %vm395_vm0, %v700_v20  ;;  %v955_v21 = vpack.c.bf16 %v700_v20, %v700_v20 }
 0x24f   : > { %v1087_v22 = vpop.eup %1086 }
 0x250   : > { %v1089_v23 = vpop.eup %1088  ;;  %725 = vst.msk [vmem:[%s1337_s25] sm:$0xf] %vm724_vm13, %v955_v21  ;;  %v701_v24 = vmul.f32 %v1087_v22, %v672_v4 }
 0x251   : > { %v702_v25 = vmul.f32 %v1089_v23, %v673_v59 }
 0x252   : > { %705 = vst.msk [vmem:[%s1323_s19 + $0x8] sm:$0xff] %vm395_vm0, %v701_v24  ;;  %v956_v26 = vpack.c.bf16 %v701_v24, %v701_v24 }
 0x253   : > { %v1091_v27 = vpop.eup %1090  ;;  %706 = vst.msk [vmem:[%s1323_s19 + $0x10] sm:$0xff] %vm395_vm0, %v702_v25  ;;  %v957_v28 = vpack.c.bf16 %v702_v25, %v702_v25 }
 0x254   : > { %726 = vst.msk [vmem:[%s1337_s25 + $0x4] sm:$0xf] %vm724_vm13, %v956_v26  ;;  %v703_v29 = vmul.f32 %v1091_v27, %v674_v3 }
 0x255   : > { %727 = vst.msk [vmem:[%s1337_s25 + $0x8] sm:$0xf] %vm724_vm13, %v957_v28 }
 0x256   : > { %707 = vst.msk [vmem:[%s1323_s19 + $0x18] sm:$0xff] %vm395_vm0, %v703_v29  ;;  %v958_v30 = vpack.c.bf16 %v703_v29, %v703_v29 }
 0x258   : > { %728 = vst.msk [vmem:[%s1337_s25 + $0xc] sm:$0xf] %vm724_vm13, %v958_v30 }
 0x259   : > { %1129 = shalt.err (!%p1126_p7)
}
 0x25a   : > { %s1130_s19 = scalar_lea.hbm %s1390_s29, 256  ;;  %s1134_s28 = scalar_lea.hbm %s1450_s6, 512 }
 0x25b   : > { %p1131_p8 = scmp.ne.s32.totalorder %s1390_s29, %s1130_s19  ;;  %p1135_p11 = scmp.lt.s32.totalorder %s1390_s29, %s1450_s6 }
 0x25c   : > { %p1136_p12 = scmp.lt.s32.totalorder %s1134_s28, %s1130_s19 }
 0x25d   : > { %p1132_p9 = pnand %p1131_p8, %p1285_p0 }
 0x25e   : > { %p1137_p13 = por %p1136_p12, %p1135_p11 }
 0x25f   : > { %p1133_p10 = pneg %p1132_p9 }
 0x261   : > { %p1138_p1 = pnand %p1137_p13, %p1133_p10 }
 0x263   : > { %1141 = shalt.err (!%p1138_p1)
}
 0x264   : > { %s1202_s4 = smov 64   ;;  %s1203_s20 = smov 4  }
 0x265   : > { %1004 = dma.vmem_to_hbm [thread:$0]  (%p1285_p0), %s1392_s13, 256, %s1390_s29, %s1400_s12, %s1202_s4, %s1202_s4, %s1203_s20  }
 0x266 PF: > { %p1010_p2 = scmp.ge.s32.totalorder %s1194_s10, 2  ;;  %s775_s24 = sand.u32 1, %s1174_s1  }
 0x267   : > { %s776_s5 = scalar_lea.sflag [#allocation7], %s775_s24 }
 0x268   : > { %p1007_p3 = pnand %p1010_p2, %p1292_p4 }
 0x26a   : > { %p1008_p5 = pneg %p1007_p3 }
 0x26c   : > { %1169 = dma.done.wait (%p1008_p5), %s776_s5, 256  }
 0x26d   : > { %1171 = vsyncadd (%p1008_p5), %s776_s5, 4294967040  ;;  %s30_s10 = sadd.s32 1, %s1194_s10   ;;  %s1462_s15 = sld [smem:[#allocation10_spill]] }
 0x26e   : > { %p27_p6 = scmp.ge.s32.totalorder %s30_s10, 4   ;;  %s1463_s1 = smov %s1178_s30 }
 0x26f   : > { %s1464_s30 = smov %s1182_s7  ;;  %s1465_s7 = smov %s1298_s18 }
 0x270   : > { %s1466_s8 = smov %s1190_s9  ;;  %29 = sbr.rel (!%p27_p6) target bundleno = 30 (0x1e), region = 97 }
 0x273   : > { %s1467_s9 = smov %s1462_s15 }
 0x275   :  { %781 = vsyncpa [#allocation7], 1 }
 0x276   :  { %783 = vsyncpa [#allocation7 + $0x1], 1 }

</bundles_post_ra>
